<compile_context>
chip_gen: v7x
topology: tpu7x:2x2x1
jax: 0.10.0
libtpu: 0.0.40
codegen_flags: <defaults>
</compile_context>

<pallas_src>
import math

import jax
import jax.numpy as jnp
from jax import lax
from jax.experimental import pallas as pl
from jax.experimental.pallas import tpu as pltpu


# ------------------------------- helpers --------------------------------------
def _round_up(n, m):
    return ((n + m - 1) // m) * m


def _pick_unroll(T):
    for u in (8, 4, 2):
        if T % u == 0:
            return min(u, T)
    return 1


def _pack_gate_cols(w_t, H, Hg, rows_out):
    """w_t: (rows, 4H) -> (rows_out, 4*Hg); gate g's H columns placed at g*Hg."""
    rows = w_t.shape[0]
    out = jnp.zeros((rows_out, 4 * Hg), jnp.float32)
    for g in range(4):
        out = out.at[:rows, g * Hg:g * Hg + H].set(w_t[:, g * H:(g + 1) * H])
    return out


def _pack_gate_bias(b, H, Hg):
    out = jnp.zeros((1, 4 * Hg), jnp.float32)
    for g in range(4):
        out = out.at[0, g * Hg:g * Hg + H].set(b[g * H:(g + 1) * H])
    return out


# --------------------------- fused model kernel --------------------------------
def _make_fused_kernel(n_layers, T, Bblk, Hg, unroll):
    """Refs (per batch block, time-major, VMEM-resident):
       in : x (T,Bblk,D), h0 (L,Bblk,Hg), c0 (L,Bblk,Hg),
            [wih_l (Din,4Hg), whh_l (Hg,4Hg), b_l (1,4Hg)] * L,
            fcw (Hg,Op), fcb (1,Op)
       out: out (T,Bblk,Op), hn (L,Bblk,Hg), cn (L,Bblk,Hg)
       scr: gx (T,Bblk,4Hg), y (T,Bblk,Hg)
    """

    def kernel(*refs):
        x_ref, h0_ref, c0_ref = refs[0], refs[1], refs[2]
        layer_refs = refs[3:3 + 3 * n_layers]
        fcw_ref = refs[3 + 3 * n_layers]
        fcb_ref = refs[4 + 3 * n_layers]
        out_ref = refs[5 + 3 * n_layers]
        hn_ref = refs[6 + 3 * n_layers]
        cn_ref = refs[7 + 3 * n_layers]
        gx_scr = refs[8 + 3 * n_layers]
        y_scr = refs[9 + 3 * n_layers]

        for layer in range(n_layers):
            wih_ref = layer_refs[3 * layer + 0]
            whh_ref = layer_refs[3 * layer + 1]
            b_ref = layer_refs[3 * layer + 2]

            # ---- hoisted input projection: one big MXU matmul for all t ----
            # Time-major (T, Bblk, .) -> (T*Bblk, .) is a free view (Bblk%8==0).
            if layer == 0:
                x2d = x_ref[...].reshape(T * Bblk, x_ref.shape[-1])
            else:
                x2d = y_scr[...].reshape(T * Bblk, Hg)
            gx = (jnp.dot(x2d, wih_ref[...], preferred_element_type=jnp.float32)
                  + b_ref[...])                                   # (T*Bblk, 4Hg)
            gx_scr[...] = gx.reshape(T, Bblk, 4 * Hg)

            # Hoist the recurrent weight load out of the time loop.
            whh = whh_ref[...]                                    # (Hg, 4Hg)

            # ---- serial recurrence: fori_loop carrying (h, c), dense per-t tiles
            def step(t, carry):
                h, c = carry
                gates = gx_scr[t] + jnp.dot(
                    h, whh, preferred_element_type=jnp.float32)   # (Bblk, 4Hg)
                # PyTorch gate order i, f, g, o.
                i = jax.nn.sigmoid(gates[:, 0 * Hg:1 * Hg])
                f = jax.nn.sigmoid(gates[:, 1 * Hg:2 * Hg])
                g = jnp.tanh(gates[:, 2 * Hg:3 * Hg])
                o = jax.nn.sigmoid(gates[:, 3 * Hg:4 * Hg])
                c = f * c + i * g
                h = o * jnp.tanh(c)
                y_scr[t] = h
                return (h, c)

            h, c = lax.fori_loop(0, T, step,
                                 (h0_ref[layer], c0_ref[layer]),
                                 unroll=unroll)
            hn_ref[layer] = h
            cn_ref[layer] = c

        # ---- fused FC epilogue (dropout is identity in eval mode) ----
        y2d = y_scr[...].reshape(T * Bblk, Hg)
        out = (jnp.dot(y2d, fcw_ref[...], preferred_element_type=jnp.float32)
               + fcb_ref[...])                                    # (T*Bblk, Op)
        out_ref[...] = out.reshape(T, Bblk, out_ref.shape[-1])

    return kernel


# --------------------------------- model wrapper ------------------------------
class EntityModelPallas:
    def __init__(self, output_size, embedding_dim, hidden_dim, n_layers,
                 drop_prob=0.5, key=None):
        self.output_size = output_size
        self.n_layers = n_layers
        self.hidden_dim = hidden_dim
        self.embedding_dim = embedding_dim
        self.drop_prob = drop_prob

        if key is None:
            key = jax.random.PRNGKey(0)
        k = 1.0 / math.sqrt(hidden_dim)

        # Raw parameters (PyTorch layout) — used by the reference check.
        self.lstm_params = []
        for layer in range(n_layers):
            d_in = embedding_dim if layer == 0 else hidden_dim
            key, k1, k2, k3, k4 = jax.random.split(key, 5)
            w_ih = jax.random.uniform(k1, (4 * hidden_dim, d_in),
                                      jnp.float32, -k, k)
            w_hh = jax.random.uniform(k2, (4 * hidden_dim, hidden_dim),
                                      jnp.float32, -k, k)
            b_ih = jax.random.uniform(k3, (4 * hidden_dim,), jnp.float32, -k, k)
            b_hh = jax.random.uniform(k4, (4 * hidden_dim,), jnp.float32, -k, k)
            self.lstm_params.append((w_ih, w_hh, b_ih, b_hh))

        key, k5, k6 = jax.random.split(key, 3)
        self.fc_w = jax.random.uniform(k5, (output_size, hidden_dim),
                                       jnp.float32, -k, k)
        self.fc_b = jax.random.uniform(k6, (output_size,), jnp.float32, -k, k)

        # --- kernel weight prep (done ONCE): transpose, combine biases, pack ---
        H = hidden_dim
        # Compact gate layout when H < 128 (e.g. H=32 -> 4H=128, one lane tile);
        # per-gate 128-lane padding only when H >= 128.
        Hg = H if H <= 128 else _round_up(H, 128)
        O = output_size
        Op = _round_up(O, 128)            # lane-dense FC output store
        self._Hg, self._Op = Hg, Op

        self.kernel_params = []
        for layer, (w_ih, w_hh, b_ih, b_hh) in enumerate(self.lstm_params):
            d_in = embedding_dim if layer == 0 else hidden_dim
            rows_out = d_in if layer == 0 else Hg
            wih_p = _pack_gate_cols(w_ih.T, H, Hg, rows_out)   # (Din, 4Hg)
            whh_p = _pack_gate_cols(w_hh.T, H, Hg, Hg)         # (Hg, 4Hg)
            b_p = _pack_gate_bias(b_ih + b_hh, H, Hg)          # (1, 4Hg)
            self.kernel_params.append((wih_p, whh_p, b_p))

        fcw_p = jnp.zeros((Hg, Op), jnp.float32).at[:H, :O].set(self.fc_w.T)
        fcb_p = jnp.zeros((1, Op), jnp.float32).at[0, :O].set(self.fc_b)
        self.fc_params = (fcw_p, fcb_p)

        self._forward = jax.jit(self._forward_impl)

    def init_hidden(self, batch_size):
        shape = (self.n_layers, batch_size, self.hidden_dim)
        return (jnp.zeros(shape, jnp.float32), jnp.zeros(shape, jnp.float32))

    def _forward_impl(self, embeds, h0, c0):
        B, T, D = embeds.shape
        H, Hg = self.hidden_dim, self._Hg
        O, Op = self.output_size, self._Op
        L = self.n_layers

        # Batch block / grid: independent batch rows -> "parallel" axis
        # (megacore on v6e, both TensorCores on v7x for production B).
        B_BLK = min(_round_up(B, 8), 64)
        Bp = _round_up(B, B_BLK)
        n_bblk = Bp // B_BLK

        # Time-major input (T, Bp, D); pad batch to the block size.
        x_t = jnp.transpose(embeds.astype(jnp.float32), (1, 0, 2))
        x_p = jnp.pad(x_t, ((0, 0), (0, Bp - B), (0, 0)))
        h0_p = jnp.pad(h0.astype(jnp.float32),
                       ((0, 0), (0, Bp - B), (0, Hg - H)))
        c0_p = jnp.pad(c0.astype(jnp.float32),
                       ((0, 0), (0, Bp - B), (0, Hg - H)))

        flat_weights = []
        for (wih_p, whh_p, b_p) in self.kernel_params:
            flat_weights += [wih_p, whh_p, b_p]
        fcw_p, fcb_p = self.fc_params

        kernel = _make_fused_kernel(L, T, B_BLK, Hg, _pick_unroll(T))

        batch_blk = lambda shape: pl.BlockSpec(shape, lambda b: (0, b, 0))
        whole_vmem = pl.BlockSpec(memory_space=pltpu.MemorySpace.VMEM)

        in_specs = ([batch_blk((T, B_BLK, D)),          # x
                     batch_blk((L, B_BLK, Hg)),         # h0
                     batch_blk((L, B_BLK, Hg))]         # c0
                    + [whole_vmem] * (3 * L + 2))       # weights (loaded once)
        out_specs = (batch_blk((T, B_BLK, Op)),         # out
                     batch_blk((L, B_BLK, Hg)),         # hn
                     batch_blk((L, B_BLK, Hg)))         # cn

        out_p, hn_p, cn_p = pl.pallas_call(
            kernel,
            grid=(n_bblk,),
            out_shape=(jax.ShapeDtypeStruct((T, Bp, Op), jnp.float32),
                       jax.ShapeDtypeStruct((L, Bp, Hg), jnp.float32),
                       jax.ShapeDtypeStruct((L, Bp, Hg), jnp.float32)),
            in_specs=in_specs,
            out_specs=out_specs,
            scratch_shapes=[pltpu.VMEM((T, B_BLK, 4 * Hg), jnp.float32),
                            pltpu.VMEM((T, B_BLK, Hg), jnp.float32)],
            # h0 -> hn, c0 -> cn reuse the same HBM buffers.
            input_output_aliases={1: 1, 2: 2},
            compiler_params=pltpu.CompilerParams(
                dimension_semantics=("parallel",),
                # Explicit budget; re-derive per generation (v7x: 64 MiB
                # physical) before scaling to production shapes.
                vmem_limit_bytes=32 * 1024 * 1024),
        )(x_p, h0_p, c0_p, *flat_weights, fcw_p, fcb_p)

        # Output rows are t-major inside the kernel; restore PyTorch's
        # lstm_out.view(-1, H) ordering (b*T + t) with a cheap wrapper slice.
        out = jnp.transpose(out_p[:, :B, :O], (1, 0, 2)).reshape(B * T, O)
        h_n = hn_p[:, :B, :H]
        c_n = cn_p[:, :B, :H]
        return out, (h_n, c_n)

    def __call__(self, embeds, hidden):
        h0, c0 = hidden
        return self._forward(embeds, h0, c0)


# ------------------------------ pure-JAX reference -----------------------------
def _reference_forward(model, embeds, hidden):
    h0, c0 = hidden
    x = embeds
    B, T, _ = x.shape
    H = model.hidden_dim
    hs, cs = [], []
    for layer in range(model.n_layers):
        w_ih, w_hh, b_ih, b_hh = model.lstm_params[layer]
        h = h0[layer]
        c = c0[layer]
        ys = []
        for t in range(T):
            gates = x[:, t, :] @ w_ih.T + h @ w_hh.T + b_ih + b_hh
            i = jax.nn.sigmoid(gates[:, 0 * H:1 * H])
            f = jax.nn.sigmoid(gates[:, 1 * H:2 * H])
            g = jnp.tanh(gates[:, 2 * H:3 * H])
            o = jax.nn.sigmoid(gates[:, 3 * H:4 * H])
            c = f * c + i * g
            h = o * jnp.tanh(c)
            ys.append(h)
        x = jnp.stack(ys, axis=1)
        hs.append(h)
        cs.append(c)
    lstm_out = x.reshape(-1, H)
    out = lstm_out @ model.fc_w.T + model.fc_b
    return out, (jnp.stack(hs), jnp.stack(cs))


# ------------------------------------ main -------------------------------------
if __name__ == "__main__":
    output_size, embedding_dim, hidden_dim, n_layers = 8, 32, 32, 2
    batch, seq = 2, 8

    key = jax.random.PRNGKey(0)
    key, k_model, k_x = jax.random.split(key, 3)

    model = EntityModelPallas(output_size, embedding_dim, hidden_dim, n_layers,
                              key=k_model)

    embeds = jax.random.normal(k_x, (batch, seq, embedding_dim), jnp.float32)
    hidden = model.init_hidden(batch)

    out, (h_n, c_n) = model(embeds, hidden)
    out = jax.block_until_ready(out)
    h_n = jax.block_until_ready(h_n)
    c_n = jax.block_until_ready(c_n)

    # Sanity-check against a pure-JAX reference implementation.
    ref_out, (ref_h, ref_c) = _reference_forward(model, embeds, hidden)
    assert out.shape == (batch * seq, output_size)
    assert h_n.shape == (n_layers, batch, hidden_dim)
    assert c_n.shape == (n_layers, batch, hidden_dim)
    assert jnp.allclose(out, ref_out, atol=1e-4, rtol=1e-4)
    assert jnp.allclose(h_n, ref_h, atol=1e-4, rtol=1e-4)
    assert jnp.allclose(c_n, ref_c, atol=1e-4, rtol=1e-4)

    print("KERNEL_OK")
</pallas_src>

<mosaic_0001>
module attributes {stable_mosaic.version = 11 : i64} {
  func.func @kernel(%arg0: i32, %arg1: memref<8x8x32xf32, #tpu.memory_space<vmem>>, %arg2: memref<2x8x32xf32, #tpu.memory_space<vmem>>, %arg3: memref<2x8x32xf32, #tpu.memory_space<vmem>>, %arg4: memref<32x128xf32, #tpu.memory_space<vmem>>, %arg5: memref<32x128xf32, #tpu.memory_space<vmem>>, %arg6: memref<1x128xf32, #tpu.memory_space<vmem>>, %arg7: memref<32x128xf32, #tpu.memory_space<vmem>>, %arg8: memref<32x128xf32, #tpu.memory_space<vmem>>, %arg9: memref<1x128xf32, #tpu.memory_space<vmem>>, %arg10: memref<32x128xf32, #tpu.memory_space<vmem>>, %arg11: memref<1x128xf32, #tpu.memory_space<vmem>>, %arg12: memref<8x8x128xf32, #tpu.memory_space<vmem>>, %arg13: memref<2x8x32xf32, #tpu.memory_space<vmem>>, %arg14: memref<2x8x32xf32, #tpu.memory_space<vmem>>, %arg15: memref<8x8x128xf32, #tpu.memory_space<vmem>>, %arg16: memref<8x8x32xf32, #tpu.memory_space<vmem>>) attributes {dimension_semantics = [#tpu.dimension_semantics<parallel>], iteration_bounds = array<i64: 1>, scalar_prefetch = 0 : i64, scratch_operands = 2 : i64, tpu.core_type = #tpu.core_type<tc>, window_params = [{transform_indices = @transform_0, window_bounds = array<i64: 8, 8, 32>}, {transform_indices = @transform_1, window_bounds = array<i64: 2, 8, 32>}, {transform_indices = @transform_2, window_bounds = array<i64: 2, 8, 32>}, {pipeline_mode = #tpu.pipeline_mode<synchronous>, transform_indices = @transform_3, window_bounds = array<i64: 32, 128>}, {pipeline_mode = #tpu.pipeline_mode<synchronous>, transform_indices = @transform_4, window_bounds = array<i64: 32, 128>}, {pipeline_mode = #tpu.pipeline_mode<synchronous>, transform_indices = @transform_5, window_bounds = array<i64: 1, 128>}, {pipeline_mode = #tpu.pipeline_mode<synchronous>, transform_indices = @transform_6, window_bounds = array<i64: 32, 128>}, {pipeline_mode = #tpu.pipeline_mode<synchronous>, transform_indices = @transform_7, window_bounds = array<i64: 32, 128>}, {pipeline_mode = #tpu.pipeline_mode<synchronous>, transform_indices = @transform_8, window_bounds = array<i64: 1, 128>}, {pipeline_mode = #tpu.pipeline_mode<synchronous>, transform_indices = @transform_9, window_bounds = array<i64: 32, 128>}, {pipeline_mode = #tpu.pipeline_mode<synchronous>, transform_indices = @transform_10, window_bounds = array<i64: 1, 128>}, {transform_indices = @transform_11, window_bounds = array<i64: 8, 8, 128>}, {transform_indices = @transform_12, window_bounds = array<i64: 2, 8, 32>}, {transform_indices = @transform_13, window_bounds = array<i64: 2, 8, 32>}]} {
    %c0 = arith.constant 0 : index
    %c0_0 = arith.constant 0 : index
    %c0_1 = arith.constant 0 : index
    %0 = vector.load %arg1[%c0, %c0_0, %c0_1] : memref<8x8x32xf32, #tpu.memory_space<vmem>>, vector<8x8x32xf32>
    %1 = vector.shape_cast %0 : vector<8x8x32xf32> to vector<64x32xf32>
    %c0_2 = arith.constant 0 : index
    %c0_3 = arith.constant 0 : index
    %2 = vector.load %arg4[%c0_2, %c0_3] : memref<32x128xf32, #tpu.memory_space<vmem>>, vector<32x128xf32>
    %cst = arith.constant dense<0.000000e+00> : vector<64x128xf32>
    %3 = tpu.matmul %1, %2, %cst {dimension_numbers = #tpu.dot_dimension_numbers<[1], [0], [0], [1], [0, 0, 1, 1], [], []>} : vector<64x32xf32>, vector<32x128xf32>, vector<64x128xf32> -> vector<64x128xf32>
    %c0_4 = arith.constant 0 : index
    %c0_5 = arith.constant 0 : index
    %4 = vector.load %arg6[%c0_4, %c0_5] : memref<1x128xf32, #tpu.memory_space<vmem>>, vector<1x128xf32>
    %5 = vector.broadcast %4 : vector<1x128xf32> to vector<64x128xf32>
    %6 = arith.addf %3, %5 : vector<64x128xf32>
    %7 = vector.shape_cast %6 : vector<64x128xf32> to vector<8x8x128xf32>
    %c0_6 = arith.constant 0 : index
    %c0_7 = arith.constant 0 : index
    %c0_8 = arith.constant 0 : index
    %8 = vector.load %arg15[%c0_6, %c0_7, %c0_8] : memref<8x8x128xf32, #tpu.memory_space<vmem>>, vector<8x8x128xf32>
    tpu.vector_store %arg15[%c0_6, %c0_7, %c0_8], %7 {strides = array<i32>} : memref<8x8x128xf32, #tpu.memory_space<vmem>>, vector<8x8x128xf32>,
    %c0_9 = arith.constant 0 : index
    %c0_10 = arith.constant 0 : index
    %9 = vector.load %arg5[%c0_9, %c0_10] : memref<32x128xf32, #tpu.memory_space<vmem>>, vector<32x128xf32>
    %c0_11 = arith.constant 0 : index
    %c0_12 = arith.constant 0 : index
    %c0_13 = arith.constant 0 : index
    %10 = vector.load %arg2[%c0_11, %c0_12, %c0_13] : memref<2x8x32xf32, #tpu.memory_space<vmem>>, vector<1x8x32xf32>
    %11 = vector.shape_cast %10 : vector<1x8x32xf32> to vector<8x32xf32>
    %c0_14 = arith.constant 0 : index
    %c0_15 = arith.constant 0 : index
    %c0_16 = arith.constant 0 : index
    %12 = vector.load %arg3[%c0_14, %c0_15, %c0_16] : memref<2x8x32xf32, #tpu.memory_space<vmem>>, vector<1x8x32xf32>
    %13 = vector.shape_cast %12 : vector<1x8x32xf32> to vector<8x32xf32>
    %c0_i32 = arith.constant 0 : i32
    %14 = arith.index_cast %c0_i32 : i32 to index
    %c0_17 = arith.constant 0 : index
    %c0_18 = arith.constant 0 : index
    %15 = vector.load %arg15[%14, %c0_17, %c0_18] : memref<8x8x128xf32, #tpu.memory_space<vmem>>, vector<1x8x128xf32>
    %16 = vector.shape_cast %15 : vector<1x8x128xf32> to vector<8x128xf32>
    %cst_19 = arith.constant dense<0.000000e+00> : vector<8x128xf32>
    %17 = tpu.matmul %11, %9, %cst_19 {dimension_numbers = #tpu.dot_dimension_numbers<[1], [0], [0], [1], [0, 0, 1, 1], [], []>} : vector<8x32xf32>, vector<32x128xf32>, vector<8x128xf32> -> vector<8x128xf32>
    %18 = arith.addf %16, %17 : vector<8x128xf32>
    %19 = vector.extract_strided_slice %18 {offsets = [0, 0], sizes = [8, 32], strides = [1, 1]} : vector<8x128xf32> to vector<8x32xf32>
    %20 = arith.negf %19 : vector<8x32xf32>
    %21 = math.exp %20 : vector<8x32xf32>
    %cst_20 = arith.constant 1.000000e+00 : f32
    %22 = vector.broadcast %cst_20 : f32 to vector<8x32xf32>
    %23 = arith.addf %22, %21 : vector<8x32xf32>
    %24 = arith.divf %22, %23 : vector<8x32xf32>
    %25 = vector.extract_strided_slice %18 {offsets = [0, 32], sizes = [8, 32], strides = [1, 1]} : vector<8x128xf32> to vector<8x32xf32>
    %26 = arith.negf %25 : vector<8x32xf32>
    %27 = math.exp %26 : vector<8x32xf32>
    %cst_21 = arith.constant 1.000000e+00 : f32
    %28 = vector.broadcast %cst_21 : f32 to vector<8x32xf32>
    %29 = arith.addf %28, %27 : vector<8x32xf32>
    %30 = arith.divf %28, %29 : vector<8x32xf32>
    %31 = vector.extract_strided_slice %18 {offsets = [0, 64], sizes = [8, 32], strides = [1, 1]} : vector<8x128xf32> to vector<8x32xf32>
    %32 = math.tanh %31 : vector<8x32xf32>
    %33 = vector.extract_strided_slice %18 {offsets = [0, 96], sizes = [8, 32], strides = [1, 1]} : vector<8x128xf32> to vector<8x32xf32>
    %34 = arith.negf %33 : vector<8x32xf32>
    %35 = math.exp %34 : vector<8x32xf32>
    %cst_22 = arith.constant 1.000000e+00 : f32
    %36 = vector.broadcast %cst_22 : f32 to vector<8x32xf32>
    %37 = arith.addf %36, %35 : vector<8x32xf32>
    %38 = arith.divf %36, %37 : vector<8x32xf32>
    %39 = arith.mulf %30, %13 : vector<8x32xf32>
    %40 = arith.mulf %24, %32 : vector<8x32xf32>
    %41 = arith.addf %39, %40 : vector<8x32xf32>
    %42 = math.tanh %41 : vector<8x32xf32>
    %43 = arith.mulf %38, %42 : vector<8x32xf32>
    %44 = arith.index_cast %c0_i32 : i32 to index
    %c0_23 = arith.constant 0 : index
    %c0_24 = arith.constant 0 : index
    %45 = vector.load %arg16[%44, %c0_23, %c0_24] : memref<8x8x32xf32, #tpu.memory_space<vmem>>, vector<1x8x32xf32>
    %46 = vector.shape_cast %45 : vector<1x8x32xf32> to vector<8x32xf32>
    %47 = vector.shape_cast %43 : vector<8x32xf32> to vector<1x8x32xf32>
    tpu.vector_store %arg16[%44, %c0_23, %c0_24], %47 {strides = array<i32>} : memref<8x8x32xf32, #tpu.memory_space<vmem>>, vector<1x8x32xf32>,
    %c1_i32 = arith.constant 1 : i32
    %48 = arith.index_cast %c1_i32 : i32 to index
    %c0_25 = arith.constant 0 : index
    %c0_26 = arith.constant 0 : index
    %49 = vector.load %arg15[%48, %c0_25, %c0_26] : memref<8x8x128xf32, #tpu.memory_space<vmem>>, vector<1x8x128xf32>
    %50 = vector.shape_cast %49 : vector<1x8x128xf32> to vector<8x128xf32>
    %cst_27 = arith.constant dense<0.000000e+00> : vector<8x128xf32>
    %51 = tpu.matmul %43, %9, %cst_27 {dimension_numbers = #tpu.dot_dimension_numbers<[1], [0], [0], [1], [0, 0, 1, 1], [], []>} : vector<8x32xf32>, vector<32x128xf32>, vector<8x128xf32> -> vector<8x128xf32>
    %52 = arith.addf %50, %51 : vector<8x128xf32>
    %53 = vector.extract_strided_slice %52 {offsets = [0, 0], sizes = [8, 32], strides = [1, 1]} : vector<8x128xf32> to vector<8x32xf32>
    %54 = arith.negf %53 : vector<8x32xf32>
    %55 = math.exp %54 : vector<8x32xf32>
    %cst_28 = arith.constant 1.000000e+00 : f32
    %56 = vector.broadcast %cst_28 : f32 to vector<8x32xf32>
    %57 = arith.addf %56, %55 : vector<8x32xf32>
    %58 = arith.divf %56, %57 : vector<8x32xf32>
    %59 = vector.extract_strided_slice %52 {offsets = [0, 32], sizes = [8, 32], strides = [1, 1]} : vector<8x128xf32> to vector<8x32xf32>
    %60 = arith.negf %59 : vector<8x32xf32>
    %61 = math.exp %60 : vector<8x32xf32>
    %cst_29 = arith.constant 1.000000e+00 : f32
    %62 = vector.broadcast %cst_29 : f32 to vector<8x32xf32>
    %63 = arith.addf %62, %61 : vector<8x32xf32>
    %64 = arith.divf %62, %63 : vector<8x32xf32>
    %65 = vector.extract_strided_slice %52 {offsets = [0, 64], sizes = [8, 32], strides = [1, 1]} : vector<8x128xf32> to vector<8x32xf32>
    %66 = math.tanh %65 : vector<8x32xf32>
    %67 = vector.extract_strided_slice %52 {offsets = [0, 96], sizes = [8, 32], strides = [1, 1]} : vector<8x128xf32> to vector<8x32xf32>
    %68 = arith.negf %67 : vector<8x32xf32>
    %69 = math.exp %68 : vector<8x32xf32>
    %cst_30 = arith.constant 1.000000e+00 : f32
    %70 = vector.broadcast %cst_30 : f32 to vector<8x32xf32>
    %71 = arith.addf %70, %69 : vector<8x32xf32>
    %72 = arith.divf %70, %71 : vector<8x32xf32>
    %73 = arith.mulf %64, %41 : vector<8x32xf32>
    %74 = arith.mulf %58, %66 : vector<8x32xf32>
    %75 = arith.addf %73, %74 : vector<8x32xf32>
    %76 = math.tanh %75 : vector<8x32xf32>
    %77 = arith.mulf %72, %76 : vector<8x32xf32>
    %78 = arith.index_cast %c1_i32 : i32 to index
    %c0_31 = arith.constant 0 : index
    %c0_32 = arith.constant 0 : index
    %79 = vector.load %arg16[%78, %c0_31, %c0_32] : memref<8x8x32xf32, #tpu.memory_space<vmem>>, vector<1x8x32xf32>
    %80 = vector.shape_cast %79 : vector<1x8x32xf32> to vector<8x32xf32>
    %81 = vector.shape_cast %77 : vector<8x32xf32> to vector<1x8x32xf32>
    tpu.vector_store %arg16[%78, %c0_31, %c0_32], %81 {strides = array<i32>} : memref<8x8x32xf32, #tpu.memory_space<vmem>>, vector<1x8x32xf32>,
    %c2_i32 = arith.constant 2 : i32
    %82 = arith.index_cast %c2_i32 : i32 to index
    %c0_33 = arith.constant 0 : index
    %c0_34 = arith.constant 0 : index
    %83 = vector.load %arg15[%82, %c0_33, %c0_34] : memref<8x8x128xf32, #tpu.memory_space<vmem>>, vector<1x8x128xf32>
    %84 = vector.shape_cast %83 : vector<1x8x128xf32> to vector<8x128xf32>
    %cst_35 = arith.constant dense<0.000000e+00> : vector<8x128xf32>
    %85 = tpu.matmul %77, %9, %cst_35 {dimension_numbers = #tpu.dot_dimension_numbers<[1], [0], [0], [1], [0, 0, 1, 1], [], []>} : vector<8x32xf32>, vector<32x128xf32>, vector<8x128xf32> -> vector<8x128xf32>
    %86 = arith.addf %84, %85 : vector<8x128xf32>
    %87 = vector.extract_strided_slice %86 {offsets = [0, 0], sizes = [8, 32], strides = [1, 1]} : vector<8x128xf32> to vector<8x32xf32>
    %88 = arith.negf %87 : vector<8x32xf32>
    %89 = math.exp %88 : vector<8x32xf32>
    %cst_36 = arith.constant 1.000000e+00 : f32
    %90 = vector.broadcast %cst_36 : f32 to vector<8x32xf32>
    %91 = arith.addf %90, %89 : vector<8x32xf32>
    %92 = arith.divf %90, %91 : vector<8x32xf32>
    %93 = vector.extract_strided_slice %86 {offsets = [0, 32], sizes = [8, 32], strides = [1, 1]} : vector<8x128xf32> to vector<8x32xf32>
    %94 = arith.negf %93 : vector<8x32xf32>
    %95 = math.exp %94 : vector<8x32xf32>
    %cst_37 = arith.constant 1.000000e+00 : f32
    %96 = vector.broadcast %cst_37 : f32 to vector<8x32xf32>
    %97 = arith.addf %96, %95 : vector<8x32xf32>
    %98 = arith.divf %96, %97 : vector<8x32xf32>
    %99 = vector.extract_strided_slice %86 {offsets = [0, 64], sizes = [8, 32], strides = [1, 1]} : vector<8x128xf32> to vector<8x32xf32>
    %100 = math.tanh %99 : vector<8x32xf32>
    %101 = vector.extract_strided_slice %86 {offsets = [0, 96], sizes = [8, 32], strides = [1, 1]} : vector<8x128xf32> to vector<8x32xf32>
    %102 = arith.negf %101 : vector<8x32xf32>
    %103 = math.exp %102 : vector<8x32xf32>
    %cst_38 = arith.constant 1.000000e+00 : f32
    %104 = vector.broadcast %cst_38 : f32 to vector<8x32xf32>
    %105 = arith.addf %104, %103 : vector<8x32xf32>
    %106 = arith.divf %104, %105 : vector<8x32xf32>
    %107 = arith.mulf %98, %75 : vector<8x32xf32>
    %108 = arith.mulf %92, %100 : vector<8x32xf32>
    %109 = arith.addf %107, %108 : vector<8x32xf32>
    %110 = math.tanh %109 : vector<8x32xf32>
    %111 = arith.mulf %106, %110 : vector<8x32xf32>
    %112 = arith.index_cast %c2_i32 : i32 to index
    %c0_39 = arith.constant 0 : index
    %c0_40 = arith.constant 0 : index
    %113 = vector.load %arg16[%112, %c0_39, %c0_40] : memref<8x8x32xf32, #tpu.memory_space<vmem>>, vector<1x8x32xf32>
    %114 = vector.shape_cast %113 : vector<1x8x32xf32> to vector<8x32xf32>
    %115 = vector.shape_cast %111 : vector<8x32xf32> to vector<1x8x32xf32>
    tpu.vector_store %arg16[%112, %c0_39, %c0_40], %115 {strides = array<i32>} : memref<8x8x32xf32, #tpu.memory_space<vmem>>, vector<1x8x32xf32>,
    %c3_i32 = arith.constant 3 : i32
    %116 = arith.index_cast %c3_i32 : i32 to index
    %c0_41 = arith.constant 0 : index
    %c0_42 = arith.constant 0 : index
    %117 = vector.load %arg15[%116, %c0_41, %c0_42] : memref<8x8x128xf32, #tpu.memory_space<vmem>>, vector<1x8x128xf32>
    %118 = vector.shape_cast %117 : vector<1x8x128xf32> to vector<8x128xf32>
    %cst_43 = arith.constant dense<0.000000e+00> : vector<8x128xf32>
    %119 = tpu.matmul %111, %9, %cst_43 {dimension_numbers = #tpu.dot_dimension_numbers<[1], [0], [0], [1], [0, 0, 1, 1], [], []>} : vector<8x32xf32>, vector<32x128xf32>, vector<8x128xf32> -> vector<8x128xf32>
    %120 = arith.addf %118, %119 : vector<8x128xf32>
    %121 = vector.extract_strided_slice %120 {offsets = [0, 0], sizes = [8, 32], strides = [1, 1]} : vector<8x128xf32> to vector<8x32xf32>
    %122 = arith.negf %121 : vector<8x32xf32>
    %123 = math.exp %122 : vector<8x32xf32>
    %cst_44 = arith.constant 1.000000e+00 : f32
    %124 = vector.broadcast %cst_44 : f32 to vector<8x32xf32>
    %125 = arith.addf %124, %123 : vector<8x32xf32>
    %126 = arith.divf %124, %125 : vector<8x32xf32>
    %127 = vector.extract_strided_slice %120 {offsets = [0, 32], sizes = [8, 32], strides = [1, 1]} : vector<8x128xf32> to vector<8x32xf32>
    %128 = arith.negf %127 : vector<8x32xf32>
    %129 = math.exp %128 : vector<8x32xf32>
    %cst_45 = arith.constant 1.000000e+00 : f32
    %130 = vector.broadcast %cst_45 : f32 to vector<8x32xf32>
    %131 = arith.addf %130, %129 : vector<8x32xf32>
    %132 = arith.divf %130, %131 : vector<8x32xf32>
    %133 = vector.extract_strided_slice %120 {offsets = [0, 64], sizes = [8, 32], strides = [1, 1]} : vector<8x128xf32> to vector<8x32xf32>
    %134 = math.tanh %133 : vector<8x32xf32>
    %135 = vector.extract_strided_slice %120 {offsets = [0, 96], sizes = [8, 32], strides = [1, 1]} : vector<8x128xf32> to vector<8x32xf32>
    %136 = arith.negf %135 : vector<8x32xf32>
    %137 = math.exp %136 : vector<8x32xf32>
    %cst_46 = arith.constant 1.000000e+00 : f32
    %138 = vector.broadcast %cst_46 : f32 to vector<8x32xf32>
    %139 = arith.addf %138, %137 : vector<8x32xf32>
    %140 = arith.divf %138, %139 : vector<8x32xf32>
    %141 = arith.mulf %132, %109 : vector<8x32xf32>
    %142 = arith.mulf %126, %134 : vector<8x32xf32>
    %143 = arith.addf %141, %142 : vector<8x32xf32>
    %144 = math.tanh %143 : vector<8x32xf32>
    %145 = arith.mulf %140, %144 : vector<8x32xf32>
    %146 = arith.index_cast %c3_i32 : i32 to index
    %c0_47 = arith.constant 0 : index
    %c0_48 = arith.constant 0 : index
    %147 = vector.load %arg16[%146, %c0_47, %c0_48] : memref<8x8x32xf32, #tpu.memory_space<vmem>>, vector<1x8x32xf32>
    %148 = vector.shape_cast %147 : vector<1x8x32xf32> to vector<8x32xf32>
    %149 = vector.shape_cast %145 : vector<8x32xf32> to vector<1x8x32xf32>
    tpu.vector_store %arg16[%146, %c0_47, %c0_48], %149 {strides = array<i32>} : memref<8x8x32xf32, #tpu.memory_space<vmem>>, vector<1x8x32xf32>,
    %c4_i32 = arith.constant 4 : i32
    %150 = arith.index_cast %c4_i32 : i32 to index
    %c0_49 = arith.constant 0 : index
    %c0_50 = arith.constant 0 : index
    %151 = vector.load %arg15[%150, %c0_49, %c0_50] : memref<8x8x128xf32, #tpu.memory_space<vmem>>, vector<1x8x128xf32>
    %152 = vector.shape_cast %151 : vector<1x8x128xf32> to vector<8x128xf32>
    %cst_51 = arith.constant dense<0.000000e+00> : vector<8x128xf32>
    %153 = tpu.matmul %145, %9, %cst_51 {dimension_numbers = #tpu.dot_dimension_numbers<[1], [0], [0], [1], [0, 0, 1, 1], [], []>} : vector<8x32xf32>, vector<32x128xf32>, vector<8x128xf32> -> vector<8x128xf32>
    %154 = arith.addf %152, %153 : vector<8x128xf32>
    %155 = vector.extract_strided_slice %154 {offsets = [0, 0], sizes = [8, 32], strides = [1, 1]} : vector<8x128xf32> to vector<8x32xf32>
    %156 = arith.negf %155 : vector<8x32xf32>
    %157 = math.exp %156 : vector<8x32xf32>
    %cst_52 = arith.constant 1.000000e+00 : f32
    %158 = vector.broadcast %cst_52 : f32 to vector<8x32xf32>
    %159 = arith.addf %158, %157 : vector<8x32xf32>
    %160 = arith.divf %158, %159 : vector<8x32xf32>
    %161 = vector.extract_strided_slice %154 {offsets = [0, 32], sizes = [8, 32], strides = [1, 1]} : vector<8x128xf32> to vector<8x32xf32>
    %162 = arith.negf %161 : vector<8x32xf32>
    %163 = math.exp %162 : vector<8x32xf32>
    %cst_53 = arith.constant 1.000000e+00 : f32
    %164 = vector.broadcast %cst_53 : f32 to vector<8x32xf32>
    %165 = arith.addf %164, %163 : vector<8x32xf32>
    %166 = arith.divf %164, %165 : vector<8x32xf32>
    %167 = vector.extract_strided_slice %154 {offsets = [0, 64], sizes = [8, 32], strides = [1, 1]} : vector<8x128xf32> to vector<8x32xf32>
    %168 = math.tanh %167 : vector<8x32xf32>
    %169 = vector.extract_strided_slice %154 {offsets = [0, 96], sizes = [8, 32], strides = [1, 1]} : vector<8x128xf32> to vector<8x32xf32>
    %170 = arith.negf %169 : vector<8x32xf32>
    %171 = math.exp %170 : vector<8x32xf32>
    %cst_54 = arith.constant 1.000000e+00 : f32
    %172 = vector.broadcast %cst_54 : f32 to vector<8x32xf32>
    %173 = arith.addf %172, %171 : vector<8x32xf32>
    %174 = arith.divf %172, %173 : vector<8x32xf32>
    %175 = arith.mulf %166, %143 : vector<8x32xf32>
    %176 = arith.mulf %160, %168 : vector<8x32xf32>
    %177 = arith.addf %175, %176 : vector<8x32xf32>
    %178 = math.tanh %177 : vector<8x32xf32>
    %179 = arith.mulf %174, %178 : vector<8x32xf32>
    %180 = arith.index_cast %c4_i32 : i32 to index
    %c0_55 = arith.constant 0 : index
    %c0_56 = arith.constant 0 : index
    %181 = vector.load %arg16[%180, %c0_55, %c0_56] : memref<8x8x32xf32, #tpu.memory_space<vmem>>, vector<1x8x32xf32>
    %182 = vector.shape_cast %181 : vector<1x8x32xf32> to vector<8x32xf32>
    %183 = vector.shape_cast %179 : vector<8x32xf32> to vector<1x8x32xf32>
    tpu.vector_store %arg16[%180, %c0_55, %c0_56], %183 {strides = array<i32>} : memref<8x8x32xf32, #tpu.memory_space<vmem>>, vector<1x8x32xf32>,
    %c5_i32 = arith.constant 5 : i32
    %184 = arith.index_cast %c5_i32 : i32 to index
    %c0_57 = arith.constant 0 : index
    %c0_58 = arith.constant 0 : index
    %185 = vector.load %arg15[%184, %c0_57, %c0_58] : memref<8x8x128xf32, #tpu.memory_space<vmem>>, vector<1x8x128xf32>
    %186 = vector.shape_cast %185 : vector<1x8x128xf32> to vector<8x128xf32>
    %cst_59 = arith.constant dense<0.000000e+00> : vector<8x128xf32>
    %187 = tpu.matmul %179, %9, %cst_59 {dimension_numbers = #tpu.dot_dimension_numbers<[1], [0], [0], [1], [0, 0, 1, 1], [], []>} : vector<8x32xf32>, vector<32x128xf32>, vector<8x128xf32> -> vector<8x128xf32>
    %188 = arith.addf %186, %187 : vector<8x128xf32>
    %189 = vector.extract_strided_slice %188 {offsets = [0, 0], sizes = [8, 32], strides = [1, 1]} : vector<8x128xf32> to vector<8x32xf32>
    %190 = arith.negf %189 : vector<8x32xf32>
    %191 = math.exp %190 : vector<8x32xf32>
    %cst_60 = arith.constant 1.000000e+00 : f32
    %192 = vector.broadcast %cst_60 : f32 to vector<8x32xf32>
    %193 = arith.addf %192, %191 : vector<8x32xf32>
    %194 = arith.divf %192, %193 : vector<8x32xf32>
    %195 = vector.extract_strided_slice %188 {offsets = [0, 32], sizes = [8, 32], strides = [1, 1]} : vector<8x128xf32> to vector<8x32xf32>
    %196 = arith.negf %195 : vector<8x32xf32>
    %197 = math.exp %196 : vector<8x32xf32>
    %cst_61 = arith.constant 1.000000e+00 : f32
    %198 = vector.broadcast %cst_61 : f32 to vector<8x32xf32>
    %199 = arith.addf %198, %197 : vector<8x32xf32>
    %200 = arith.divf %198, %199 : vector<8x32xf32>
    %201 = vector.extract_strided_slice %188 {offsets = [0, 64], sizes = [8, 32], strides = [1, 1]} : vector<8x128xf32> to vector<8x32xf32>
    %202 = math.tanh %201 : vector<8x32xf32>
    %203 = vector.extract_strided_slice %188 {offsets = [0, 96], sizes = [8, 32], strides = [1, 1]} : vector<8x128xf32> to vector<8x32xf32>
    %204 = arith.negf %203 : vector<8x32xf32>
    %205 = math.exp %204 : vector<8x32xf32>
    %cst_62 = arith.constant 1.000000e+00 : f32
    %206 = vector.broadcast %cst_62 : f32 to vector<8x32xf32>
    %207 = arith.addf %206, %205 : vector<8x32xf32>
    %208 = arith.divf %206, %207 : vector<8x32xf32>
    %209 = arith.mulf %200, %177 : vector<8x32xf32>
    %210 = arith.mulf %194, %202 : vector<8x32xf32>
    %211 = arith.addf %209, %210 : vector<8x32xf32>
    %212 = math.tanh %211 : vector<8x32xf32>
    %213 = arith.mulf %208, %212 : vector<8x32xf32>
    %214 = arith.index_cast %c5_i32 : i32 to index
    %c0_63 = arith.constant 0 : index
    %c0_64 = arith.constant 0 : index
    %215 = vector.load %arg16[%214, %c0_63, %c0_64] : memref<8x8x32xf32, #tpu.memory_space<vmem>>, vector<1x8x32xf32>
    %216 = vector.shape_cast %215 : vector<1x8x32xf32> to vector<8x32xf32>
    %217 = vector.shape_cast %213 : vector<8x32xf32> to vector<1x8x32xf32>
    tpu.vector_store %arg16[%214, %c0_63, %c0_64], %217 {strides = array<i32>} : memref<8x8x32xf32, #tpu.memory_space<vmem>>, vector<1x8x32xf32>,
    %c6_i32 = arith.constant 6 : i32
    %218 = arith.index_cast %c6_i32 : i32 to index
    %c0_65 = arith.constant 0 : index
    %c0_66 = arith.constant 0 : index
    %219 = vector.load %arg15[%218, %c0_65, %c0_66] : memref<8x8x128xf32, #tpu.memory_space<vmem>>, vector<1x8x128xf32>
    %220 = vector.shape_cast %219 : vector<1x8x128xf32> to vector<8x128xf32>
    %cst_67 = arith.constant dense<0.000000e+00> : vector<8x128xf32>
    %221 = tpu.matmul %213, %9, %cst_67 {dimension_numbers = #tpu.dot_dimension_numbers<[1], [0], [0], [1], [0, 0, 1, 1], [], []>} : vector<8x32xf32>, vector<32x128xf32>, vector<8x128xf32> -> vector<8x128xf32>
    %222 = arith.addf %220, %221 : vector<8x128xf32>
    %223 = vector.extract_strided_slice %222 {offsets = [0, 0], sizes = [8, 32], strides = [1, 1]} : vector<8x128xf32> to vector<8x32xf32>
    %224 = arith.negf %223 : vector<8x32xf32>
    %225 = math.exp %224 : vector<8x32xf32>
    %cst_68 = arith.constant 1.000000e+00 : f32
    %226 = vector.broadcast %cst_68 : f32 to vector<8x32xf32>
    %227 = arith.addf %226, %225 : vector<8x32xf32>
    %228 = arith.divf %226, %227 : vector<8x32xf32>
    %229 = vector.extract_strided_slice %222 {offsets = [0, 32], sizes = [8, 32], strides = [1, 1]} : vector<8x128xf32> to vector<8x32xf32>
    %230 = arith.negf %229 : vector<8x32xf32>
    %231 = math.exp %230 : vector<8x32xf32>
    %cst_69 = arith.constant 1.000000e+00 : f32
    %232 = vector.broadcast %cst_69 : f32 to vector<8x32xf32>
    %233 = arith.addf %232, %231 : vector<8x32xf32>
    %234 = arith.divf %232, %233 : vector<8x32xf32>
    %235 = vector.extract_strided_slice %222 {offsets = [0, 64], sizes = [8, 32], strides = [1, 1]} : vector<8x128xf32> to vector<8x32xf32>
    %236 = math.tanh %235 : vector<8x32xf32>
    %237 = vector.extract_strided_slice %222 {offsets = [0, 96], sizes = [8, 32], strides = [1, 1]} : vector<8x128xf32> to vector<8x32xf32>
    %238 = arith.negf %237 : vector<8x32xf32>
    %239 = math.exp %238 : vector<8x32xf32>
    %cst_70 = arith.constant 1.000000e+00 : f32
    %240 = vector.broadcast %cst_70 : f32 to vector<8x32xf32>
    %241 = arith.addf %240, %239 : vector<8x32xf32>
    %242 = arith.divf %240, %241 : vector<8x32xf32>
    %243 = arith.mulf %234, %211 : vector<8x32xf32>
    %244 = arith.mulf %228, %236 : vector<8x32xf32>
    %245 = arith.addf %243, %244 : vector<8x32xf32>
    %246 = math.tanh %245 : vector<8x32xf32>
    %247 = arith.mulf %242, %246 : vector<8x32xf32>
    %248 = arith.index_cast %c6_i32 : i32 to index
    %c0_71 = arith.constant 0 : index
    %c0_72 = arith.constant 0 : index
    %249 = vector.load %arg16[%248, %c0_71, %c0_72] : memref<8x8x32xf32, #tpu.memory_space<vmem>>, vector<1x8x32xf32>
    %250 = vector.shape_cast %249 : vector<1x8x32xf32> to vector<8x32xf32>
    %251 = vector.shape_cast %247 : vector<8x32xf32> to vector<1x8x32xf32>
    tpu.vector_store %arg16[%248, %c0_71, %c0_72], %251 {strides = array<i32>} : memref<8x8x32xf32, #tpu.memory_space<vmem>>, vector<1x8x32xf32>,
    %c7_i32 = arith.constant 7 : i32
    %252 = arith.index_cast %c7_i32 : i32 to index
    %c0_73 = arith.constant 0 : index
    %c0_74 = arith.constant 0 : index
    %253 = vector.load %arg15[%252, %c0_73, %c0_74] : memref<8x8x128xf32, #tpu.memory_space<vmem>>, vector<1x8x128xf32>
    %254 = vector.shape_cast %253 : vector<1x8x128xf32> to vector<8x128xf32>
    %cst_75 = arith.constant dense<0.000000e+00> : vector<8x128xf32>
    %255 = tpu.matmul %247, %9, %cst_75 {dimension_numbers = #tpu.dot_dimension_numbers<[1], [0], [0], [1], [0, 0, 1, 1], [], []>} : vector<8x32xf32>, vector<32x128xf32>, vector<8x128xf32> -> vector<8x128xf32>
    %256 = arith.addf %254, %255 : vector<8x128xf32>
    %257 = vector.extract_strided_slice %256 {offsets = [0, 0], sizes = [8, 32], strides = [1, 1]} : vector<8x128xf32> to vector<8x32xf32>
    %258 = arith.negf %257 : vector<8x32xf32>
    %259 = math.exp %258 : vector<8x32xf32>
    %cst_76 = arith.constant 1.000000e+00 : f32
    %260 = vector.broadcast %cst_76 : f32 to vector<8x32xf32>
    %261 = arith.addf %260, %259 : vector<8x32xf32>
    %262 = arith.divf %260, %261 : vector<8x32xf32>
    %263 = vector.extract_strided_slice %256 {offsets = [0, 32], sizes = [8, 32], strides = [1, 1]} : vector<8x128xf32> to vector<8x32xf32>
    %264 = arith.negf %263 : vector<8x32xf32>
    %265 = math.exp %264 : vector<8x32xf32>
    %cst_77 = arith.constant 1.000000e+00 : f32
    %266 = vector.broadcast %cst_77 : f32 to vector<8x32xf32>
    %267 = arith.addf %266, %265 : vector<8x32xf32>
    %268 = arith.divf %266, %267 : vector<8x32xf32>
    %269 = vector.extract_strided_slice %256 {offsets = [0, 64], sizes = [8, 32], strides = [1, 1]} : vector<8x128xf32> to vector<8x32xf32>
    %270 = math.tanh %269 : vector<8x32xf32>
    %271 = vector.extract_strided_slice %256 {offsets = [0, 96], sizes = [8, 32], strides = [1, 1]} : vector<8x128xf32> to vector<8x32xf32>
    %272 = arith.negf %271 : vector<8x32xf32>
    %273 = math.exp %272 : vector<8x32xf32>
    %cst_78 = arith.constant 1.000000e+00 : f32
    %274 = vector.broadcast %cst_78 : f32 to vector<8x32xf32>
    %275 = arith.addf %274, %273 : vector<8x32xf32>
    %276 = arith.divf %274, %275 : vector<8x32xf32>
    %277 = arith.mulf %268, %245 : vector<8x32xf32>
    %278 = arith.mulf %262, %270 : vector<8x32xf32>
    %279 = arith.addf %277, %278 : vector<8x32xf32>
    %280 = math.tanh %279 : vector<8x32xf32>
    %281 = arith.mulf %276, %280 : vector<8x32xf32>
    %282 = arith.index_cast %c7_i32 : i32 to index
    %c0_79 = arith.constant 0 : index
    %c0_80 = arith.constant 0 : index
    %283 = vector.load %arg16[%282, %c0_79, %c0_80] : memref<8x8x32xf32, #tpu.memory_space<vmem>>, vector<1x8x32xf32>
    %284 = vector.shape_cast %283 : vector<1x8x32xf32> to vector<8x32xf32>
    %285 = vector.shape_cast %281 : vector<8x32xf32> to vector<1x8x32xf32>
    tpu.vector_store %arg16[%282, %c0_79, %c0_80], %285 {strides = array<i32>} : memref<8x8x32xf32, #tpu.memory_space<vmem>>, vector<1x8x32xf32>,
    %c8_i32 = arith.constant 8 : i32
    %c0_81 = arith.constant 0 : index
    %c0_82 = arith.constant 0 : index
    %c0_83 = arith.constant 0 : index
    %286 = vector.load %arg13[%c0_81, %c0_82, %c0_83] : memref<2x8x32xf32, #tpu.memory_space<vmem>>, vector<1x8x32xf32>
    %287 = vector.shape_cast %286 : vector<1x8x32xf32> to vector<8x32xf32>
    %288 = vector.shape_cast %281 : vector<8x32xf32> to vector<1x8x32xf32>
    tpu.vector_store %arg13[%c0_81, %c0_82, %c0_83], %288 {strides = array<i32>} : memref<2x8x32xf32, #tpu.memory_space<vmem>>, vector<1x8x32xf32>,
    %c0_84 = arith.constant 0 : index
    %c0_85 = arith.constant 0 : index
    %c0_86 = arith.constant 0 : index
    %289 = vector.load %arg14[%c0_84, %c0_85, %c0_86] : memref<2x8x32xf32, #tpu.memory_space<vmem>>, vector<1x8x32xf32>
    %290 = vector.shape_cast %289 : vector<1x8x32xf32> to vector<8x32xf32>
    %291 = vector.shape_cast %279 : vector<8x32xf32> to vector<1x8x32xf32>
    tpu.vector_store %arg14[%c0_84, %c0_85, %c0_86], %291 {strides = array<i32>} : memref<2x8x32xf32, #tpu.memory_space<vmem>>, vector<1x8x32xf32>,
    %c0_87 = arith.constant 0 : index
    %c0_88 = arith.constant 0 : index
    %c0_89 = arith.constant 0 : index
    %292 = vector.load %arg16[%c0_87, %c0_88, %c0_89] : memref<8x8x32xf32, #tpu.memory_space<vmem>>, vector<8x8x32xf32>
    %293 = vector.shape_cast %292 : vector<8x8x32xf32> to vector<64x32xf32>
    %c0_90 = arith.constant 0 : index
    %c0_91 = arith.constant 0 : index
    %294 = vector.load %arg7[%c0_90, %c0_91] : memref<32x128xf32, #tpu.memory_space<vmem>>, vector<32x128xf32>
    %cst_92 = arith.constant dense<0.000000e+00> : vector<64x128xf32>
    %295 = tpu.matmul %293, %294, %cst_92 {dimension_numbers = #tpu.dot_dimension_numbers<[1], [0], [0], [1], [0, 0, 1, 1], [], []>} : vector<64x32xf32>, vector<32x128xf32>, vector<64x128xf32> -> vector<64x128xf32>
    %c0_93 = arith.constant 0 : index
    %c0_94 = arith.constant 0 : index
    %296 = vector.load %arg9[%c0_93, %c0_94] : memref<1x128xf32, #tpu.memory_space<vmem>>, vector<1x128xf32>
    %297 = vector.broadcast %296 : vector<1x128xf32> to vector<64x128xf32>
    %298 = arith.addf %295, %297 : vector<64x128xf32>
    %299 = vector.shape_cast %298 : vector<64x128xf32> to vector<8x8x128xf32>
    %c0_95 = arith.constant 0 : index
    %c0_96 = arith.constant 0 : index
    %c0_97 = arith.constant 0 : index
    %300 = vector.load %arg15[%c0_95, %c0_96, %c0_97] : memref<8x8x128xf32, #tpu.memory_space<vmem>>, vector<8x8x128xf32>
    tpu.vector_store %arg15[%c0_95, %c0_96, %c0_97], %299 {strides = array<i32>} : memref<8x8x128xf32, #tpu.memory_space<vmem>>, vector<8x8x128xf32>,
    %c0_98 = arith.constant 0 : index
    %c0_99 = arith.constant 0 : index
    %301 = vector.load %arg8[%c0_98, %c0_99] : memref<32x128xf32, #tpu.memory_space<vmem>>, vector<32x128xf32>
    %c1 = arith.constant 1 : index
    %c0_100 = arith.constant 0 : index
    %c0_101 = arith.constant 0 : index
    %302 = vector.load %arg2[%c1, %c0_100, %c0_101] : memref<2x8x32xf32, #tpu.memory_space<vmem>>, vector<1x8x32xf32>
    %303 = vector.shape_cast %302 : vector<1x8x32xf32> to vector<8x32xf32>
    %c1_102 = arith.constant 1 : index
    %c0_103 = arith.constant 0 : index
    %c0_104 = arith.constant 0 : index
    %304 = vector.load %arg3[%c1_102, %c0_103, %c0_104] : memref<2x8x32xf32, #tpu.memory_space<vmem>>, vector<1x8x32xf32>
    %305 = vector.shape_cast %304 : vector<1x8x32xf32> to vector<8x32xf32>
    %c0_i32_105 = arith.constant 0 : i32
    %306 = arith.index_cast %c0_i32_105 : i32 to index
    %c0_106 = arith.constant 0 : index
    %c0_107 = arith.constant 0 : index
    %307 = vector.load %arg15[%306, %c0_106, %c0_107] : memref<8x8x128xf32, #tpu.memory_space<vmem>>, vector<1x8x128xf32>
    %308 = vector.shape_cast %307 : vector<1x8x128xf32> to vector<8x128xf32>
    %cst_108 = arith.constant dense<0.000000e+00> : vector<8x128xf32>
    %309 = tpu.matmul %303, %301, %cst_108 {dimension_numbers = #tpu.dot_dimension_numbers<[1], [0], [0], [1], [0, 0, 1, 1], [], []>} : vector<8x32xf32>, vector<32x128xf32>, vector<8x128xf32> -> vector<8x128xf32>
    %310 = arith.addf %308, %309 : vector<8x128xf32>
    %311 = vector.extract_strided_slice %310 {offsets = [0, 0], sizes = [8, 32], strides = [1, 1]} : vector<8x128xf32> to vector<8x32xf32>
    %312 = arith.negf %311 : vector<8x32xf32>
    %313 = math.exp %312 : vector<8x32xf32>
    %cst_109 = arith.constant 1.000000e+00 : f32
    %314 = vector.broadcast %cst_109 : f32 to vector<8x32xf32>
    %315 = arith.addf %314, %313 : vector<8x32xf32>
    %316 = arith.divf %314, %315 : vector<8x32xf32>
    %317 = vector.extract_strided_slice %310 {offsets = [0, 32], sizes = [8, 32], strides = [1, 1]} : vector<8x128xf32> to vector<8x32xf32>
    %318 = arith.negf %317 : vector<8x32xf32>
    %319 = math.exp %318 : vector<8x32xf32>
    %cst_110 = arith.constant 1.000000e+00 : f32
    %320 = vector.broadcast %cst_110 : f32 to vector<8x32xf32>
    %321 = arith.addf %320, %319 : vector<8x32xf32>
    %322 = arith.divf %320, %321 : vector<8x32xf32>
    %323 = vector.extract_strided_slice %310 {offsets = [0, 64], sizes = [8, 32], strides = [1, 1]} : vector<8x128xf32> to vector<8x32xf32>
    %324 = math.tanh %323 : vector<8x32xf32>
    %325 = vector.extract_strided_slice %310 {offsets = [0, 96], sizes = [8, 32], strides = [1, 1]} : vector<8x128xf32> to vector<8x32xf32>
    %326 = arith.negf %325 : vector<8x32xf32>
    %327 = math.exp %326 : vector<8x32xf32>
    %cst_111 = arith.constant 1.000000e+00 : f32
    %328 = vector.broadcast %cst_111 : f32 to vector<8x32xf32>
    %329 = arith.addf %328, %327 : vector<8x32xf32>
    %330 = arith.divf %328, %329 : vector<8x32xf32>
    %331 = arith.mulf %322, %305 : vector<8x32xf32>
    %332 = arith.mulf %316, %324 : vector<8x32xf32>
    %333 = arith.addf %331, %332 : vector<8x32xf32>
    %334 = math.tanh %333 : vector<8x32xf32>
    %335 = arith.mulf %330, %334 : vector<8x32xf32>
    %336 = arith.index_cast %c0_i32_105 : i32 to index
    %c0_112 = arith.constant 0 : index
    %c0_113 = arith.constant 0 : index
    %337 = vector.load %arg16[%336, %c0_112, %c0_113] : memref<8x8x32xf32, #tpu.memory_space<vmem>>, vector<1x8x32xf32>
    %338 = vector.shape_cast %337 : vector<1x8x32xf32> to vector<8x32xf32>
    %339 = vector.shape_cast %335 : vector<8x32xf32> to vector<1x8x32xf32>
    tpu.vector_store %arg16[%336, %c0_112, %c0_113], %339 {strides = array<i32>} : memref<8x8x32xf32, #tpu.memory_space<vmem>>, vector<1x8x32xf32>,
    %c1_i32_114 = arith.constant 1 : i32
    %340 = arith.index_cast %c1_i32_114 : i32 to index
    %c0_115 = arith.constant 0 : index
    %c0_116 = arith.constant 0 : index
    %341 = vector.load %arg15[%340, %c0_115, %c0_116] : memref<8x8x128xf32, #tpu.memory_space<vmem>>, vector<1x8x128xf32>
    %342 = vector.shape_cast %341 : vector<1x8x128xf32> to vector<8x128xf32>
    %cst_117 = arith.constant dense<0.000000e+00> : vector<8x128xf32>
    %343 = tpu.matmul %335, %301, %cst_117 {dimension_numbers = #tpu.dot_dimension_numbers<[1], [0], [0], [1], [0, 0, 1, 1], [], []>} : vector<8x32xf32>, vector<32x128xf32>, vector<8x128xf32> -> vector<8x128xf32>
    %344 = arith.addf %342, %343 : vector<8x128xf32>
    %345 = vector.extract_strided_slice %344 {offsets = [0, 0], sizes = [8, 32], strides = [1, 1]} : vector<8x128xf32> to vector<8x32xf32>
    %346 = arith.negf %345 : vector<8x32xf32>
    %347 = math.exp %346 : vector<8x32xf32>
    %cst_118 = arith.constant 1.000000e+00 : f32
    %348 = vector.broadcast %cst_118 : f32 to vector<8x32xf32>
    %349 = arith.addf %348, %347 : vector<8x32xf32>
    %350 = arith.divf %348, %349 : vector<8x32xf32>
    %351 = vector.extract_strided_slice %344 {offsets = [0, 32], sizes = [8, 32], strides = [1, 1]} : vector<8x128xf32> to vector<8x32xf32>
    %352 = arith.negf %351 : vector<8x32xf32>
    %353 = math.exp %352 : vector<8x32xf32>
    %cst_119 = arith.constant 1.000000e+00 : f32
    %354 = vector.broadcast %cst_119 : f32 to vector<8x32xf32>
    %355 = arith.addf %354, %353 : vector<8x32xf32>
    %356 = arith.divf %354, %355 : vector<8x32xf32>
    %357 = vector.extract_strided_slice %344 {offsets = [0, 64], sizes = [8, 32], strides = [1, 1]} : vector<8x128xf32> to vector<8x32xf32>
    %358 = math.tanh %357 : vector<8x32xf32>
    %359 = vector.extract_strided_slice %344 {offsets = [0, 96], sizes = [8, 32], strides = [1, 1]} : vector<8x128xf32> to vector<8x32xf32>
    %360 = arith.negf %359 : vector<8x32xf32>
    %361 = math.exp %360 : vector<8x32xf32>
    %cst_120 = arith.constant 1.000000e+00 : f32
    %362 = vector.broadcast %cst_120 : f32 to vector<8x32xf32>
    %363 = arith.addf %362, %361 : vector<8x32xf32>
    %364 = arith.divf %362, %363 : vector<8x32xf32>
    %365 = arith.mulf %356, %333 : vector<8x32xf32>
    %366 = arith.mulf %350, %358 : vector<8x32xf32>
    %367 = arith.addf %365, %366 : vector<8x32xf32>
    %368 = math.tanh %367 : vector<8x32xf32>
    %369 = arith.mulf %364, %368 : vector<8x32xf32>
    %370 = arith.index_cast %c1_i32_114 : i32 to index
    %c0_121 = arith.constant 0 : index
    %c0_122 = arith.constant 0 : index
    %371 = vector.load %arg16[%370, %c0_121, %c0_122] : memref<8x8x32xf32, #tpu.memory_space<vmem>>, vector<1x8x32xf32>
    %372 = vector.shape_cast %371 : vector<1x8x32xf32> to vector<8x32xf32>
    %373 = vector.shape_cast %369 : vector<8x32xf32> to vector<1x8x32xf32>
    tpu.vector_store %arg16[%370, %c0_121, %c0_122], %373 {strides = array<i32>} : memref<8x8x32xf32, #tpu.memory_space<vmem>>, vector<1x8x32xf32>,
    %c2_i32_123 = arith.constant 2 : i32
    %374 = arith.index_cast %c2_i32_123 : i32 to index
    %c0_124 = arith.constant 0 : index
    %c0_125 = arith.constant 0 : index
    %375 = vector.load %arg15[%374, %c0_124, %c0_125] : memref<8x8x128xf32, #tpu.memory_space<vmem>>, vector<1x8x128xf32>
    %376 = vector.shape_cast %375 : vector<1x8x128xf32> to vector<8x128xf32>
    %cst_126 = arith.constant dense<0.000000e+00> : vector<8x128xf32>
    %377 = tpu.matmul %369, %301, %cst_126 {dimension_numbers = #tpu.dot_dimension_numbers<[1], [0], [0], [1], [0, 0, 1, 1], [], []>} : vector<8x32xf32>, vector<32x128xf32>, vector<8x128xf32> -> vector<8x128xf32>
    %378 = arith.addf %376, %377 : vector<8x128xf32>
    %379 = vector.extract_strided_slice %378 {offsets = [0, 0], sizes = [8, 32], strides = [1, 1]} : vector<8x128xf32> to vector<8x32xf32>
    %380 = arith.negf %379 : vector<8x32xf32>
    %381 = math.exp %380 : vector<8x32xf32>
    %cst_127 = arith.constant 1.000000e+00 : f32
    %382 = vector.broadcast %cst_127 : f32 to vector<8x32xf32>
    %383 = arith.addf %382, %381 : vector<8x32xf32>
    %384 = arith.divf %382, %383 : vector<8x32xf32>
    %385 = vector.extract_strided_slice %378 {offsets = [0, 32], sizes = [8, 32], strides = [1, 1]} : vector<8x128xf32> to vector<8x32xf32>
    %386 = arith.negf %385 : vector<8x32xf32>
    %387 = math.exp %386 : vector<8x32xf32>
    %cst_128 = arith.constant 1.000000e+00 : f32
    %388 = vector.broadcast %cst_128 : f32 to vector<8x32xf32>
    %389 = arith.addf %388, %387 : vector<8x32xf32>
    %390 = arith.divf %388, %389 : vector<8x32xf32>
    %391 = vector.extract_strided_slice %378 {offsets = [0, 64], sizes = [8, 32], strides = [1, 1]} : vector<8x128xf32> to vector<8x32xf32>
    %392 = math.tanh %391 : vector<8x32xf32>
    %393 = vector.extract_strided_slice %378 {offsets = [0, 96], sizes = [8, 32], strides = [1, 1]} : vector<8x128xf32> to vector<8x32xf32>
    %394 = arith.negf %393 : vector<8x32xf32>
    %395 = math.exp %394 : vector<8x32xf32>
    %cst_129 = arith.constant 1.000000e+00 : f32
    %396 = vector.broadcast %cst_129 : f32 to vector<8x32xf32>
    %397 = arith.addf %396, %395 : vector<8x32xf32>
    %398 = arith.divf %396, %397 : vector<8x32xf32>
    %399 = arith.mulf %390, %367 : vector<8x32xf32>
    %400 = arith.mulf %384, %392 : vector<8x32xf32>
    %401 = arith.addf %399, %400 : vector<8x32xf32>
    %402 = math.tanh %401 : vector<8x32xf32>
    %403 = arith.mulf %398, %402 : vector<8x32xf32>
    %404 = arith.index_cast %c2_i32_123 : i32 to index
    %c0_130 = arith.constant 0 : index
    %c0_131 = arith.constant 0 : index
    %405 = vector.load %arg16[%404, %c0_130, %c0_131] : memref<8x8x32xf32, #tpu.memory_space<vmem>>, vector<1x8x32xf32>
    %406 = vector.shape_cast %405 : vector<1x8x32xf32> to vector<8x32xf32>
    %407 = vector.shape_cast %403 : vector<8x32xf32> to vector<1x8x32xf32>
    tpu.vector_store %arg16[%404, %c0_130, %c0_131], %407 {strides = array<i32>} : memref<8x8x32xf32, #tpu.memory_space<vmem>>, vector<1x8x32xf32>,
    %c3_i32_132 = arith.constant 3 : i32
    %408 = arith.index_cast %c3_i32_132 : i32 to index
    %c0_133 = arith.constant 0 : index
    %c0_134 = arith.constant 0 : index
    %409 = vector.load %arg15[%408, %c0_133, %c0_134] : memref<8x8x128xf32, #tpu.memory_space<vmem>>, vector<1x8x128xf32>
    %410 = vector.shape_cast %409 : vector<1x8x128xf32> to vector<8x128xf32>
    %cst_135 = arith.constant dense<0.000000e+00> : vector<8x128xf32>
    %411 = tpu.matmul %403, %301, %cst_135 {dimension_numbers = #tpu.dot_dimension_numbers<[1], [0], [0], [1], [0, 0, 1, 1], [], []>} : vector<8x32xf32>, vector<32x128xf32>, vector<8x128xf32> -> vector<8x128xf32>
    %412 = arith.addf %410, %411 : vector<8x128xf32>
    %413 = vector.extract_strided_slice %412 {offsets = [0, 0], sizes = [8, 32], strides = [1, 1]} : vector<8x128xf32> to vector<8x32xf32>
    %414 = arith.negf %413 : vector<8x32xf32>
    %415 = math.exp %414 : vector<8x32xf32>
    %cst_136 = arith.constant 1.000000e+00 : f32
    %416 = vector.broadcast %cst_136 : f32 to vector<8x32xf32>
    %417 = arith.addf %416, %415 : vector<8x32xf32>
    %418 = arith.divf %416, %417 : vector<8x32xf32>
    %419 = vector.extract_strided_slice %412 {offsets = [0, 32], sizes = [8, 32], strides = [1, 1]} : vector<8x128xf32> to vector<8x32xf32>
    %420 = arith.negf %419 : vector<8x32xf32>
    %421 = math.exp %420 : vector<8x32xf32>
    %cst_137 = arith.constant 1.000000e+00 : f32
    %422 = vector.broadcast %cst_137 : f32 to vector<8x32xf32>
    %423 = arith.addf %422, %421 : vector<8x32xf32>
    %424 = arith.divf %422, %423 : vector<8x32xf32>
    %425 = vector.extract_strided_slice %412 {offsets = [0, 64], sizes = [8, 32], strides = [1, 1]} : vector<8x128xf32> to vector<8x32xf32>
    %426 = math.tanh %425 : vector<8x32xf32>
    %427 = vector.extract_strided_slice %412 {offsets = [0, 96], sizes = [8, 32], strides = [1, 1]} : vector<8x128xf32> to vector<8x32xf32>
    %428 = arith.negf %427 : vector<8x32xf32>
    %429 = math.exp %428 : vector<8x32xf32>
    %cst_138 = arith.constant 1.000000e+00 : f32
    %430 = vector.broadcast %cst_138 : f32 to vector<8x32xf32>
    %431 = arith.addf %430, %429 : vector<8x32xf32>
    %432 = arith.divf %430, %431 : vector<8x32xf32>
    %433 = arith.mulf %424, %401 : vector<8x32xf32>
    %434 = arith.mulf %418, %426 : vector<8x32xf32>
    %435 = arith.addf %433, %434 : vector<8x32xf32>
    %436 = math.tanh %435 : vector<8x32xf32>
    %437 = arith.mulf %432, %436 : vector<8x32xf32>
    %438 = arith.index_cast %c3_i32_132 : i32 to index
    %c0_139 = arith.constant 0 : index
    %c0_140 = arith.constant 0 : index
    %439 = vector.load %arg16[%438, %c0_139, %c0_140] : memref<8x8x32xf32, #tpu.memory_space<vmem>>, vector<1x8x32xf32>
    %440 = vector.shape_cast %439 : vector<1x8x32xf32> to vector<8x32xf32>
    %441 = vector.shape_cast %437 : vector<8x32xf32> to vector<1x8x32xf32>
    tpu.vector_store %arg16[%438, %c0_139, %c0_140], %441 {strides = array<i32>} : memref<8x8x32xf32, #tpu.memory_space<vmem>>, vector<1x8x32xf32>,
    %c4_i32_141 = arith.constant 4 : i32
    %442 = arith.index_cast %c4_i32_141 : i32 to index
    %c0_142 = arith.constant 0 : index
    %c0_143 = arith.constant 0 : index
    %443 = vector.load %arg15[%442, %c0_142, %c0_143] : memref<8x8x128xf32, #tpu.memory_space<vmem>>, vector<1x8x128xf32>
    %444 = vector.shape_cast %443 : vector<1x8x128xf32> to vector<8x128xf32>
    %cst_144 = arith.constant dense<0.000000e+00> : vector<8x128xf32>
    %445 = tpu.matmul %437, %301, %cst_144 {dimension_numbers = #tpu.dot_dimension_numbers<[1], [0], [0], [1], [0, 0, 1, 1], [], []>} : vector<8x32xf32>, vector<32x128xf32>, vector<8x128xf32> -> vector<8x128xf32>
    %446 = arith.addf %444, %445 : vector<8x128xf32>
    %447 = vector.extract_strided_slice %446 {offsets = [0, 0], sizes = [8, 32], strides = [1, 1]} : vector<8x128xf32> to vector<8x32xf32>
    %448 = arith.negf %447 : vector<8x32xf32>
    %449 = math.exp %448 : vector<8x32xf32>
    %cst_145 = arith.constant 1.000000e+00 : f32
    %450 = vector.broadcast %cst_145 : f32 to vector<8x32xf32>
    %451 = arith.addf %450, %449 : vector<8x32xf32>
    %452 = arith.divf %450, %451 : vector<8x32xf32>
    %453 = vector.extract_strided_slice %446 {offsets = [0, 32], sizes = [8, 32], strides = [1, 1]} : vector<8x128xf32> to vector<8x32xf32>
    %454 = arith.negf %453 : vector<8x32xf32>
    %455 = math.exp %454 : vector<8x32xf32>
    %cst_146 = arith.constant 1.000000e+00 : f32
    %456 = vector.broadcast %cst_146 : f32 to vector<8x32xf32>
    %457 = arith.addf %456, %455 : vector<8x32xf32>
    %458 = arith.divf %456, %457 : vector<8x32xf32>
    %459 = vector.extract_strided_slice %446 {offsets = [0, 64], sizes = [8, 32], strides = [1, 1]} : vector<8x128xf32> to vector<8x32xf32>
    %460 = math.tanh %459 : vector<8x32xf32>
    %461 = vector.extract_strided_slice %446 {offsets = [0, 96], sizes = [8, 32], strides = [1, 1]} : vector<8x128xf32> to vector<8x32xf32>
    %462 = arith.negf %461 : vector<8x32xf32>
    %463 = math.exp %462 : vector<8x32xf32>
    %cst_147 = arith.constant 1.000000e+00 : f32
    %464 = vector.broadcast %cst_147 : f32 to vector<8x32xf32>
    %465 = arith.addf %464, %463 : vector<8x32xf32>
    %466 = arith.divf %464, %465 : vector<8x32xf32>
    %467 = arith.mulf %458, %435 : vector<8x32xf32>
    %468 = arith.mulf %452, %460 : vector<8x32xf32>
    %469 = arith.addf %467, %468 : vector<8x32xf32>
    %470 = math.tanh %469 : vector<8x32xf32>
    %471 = arith.mulf %466, %470 : vector<8x32xf32>
    %472 = arith.index_cast %c4_i32_141 : i32 to index
    %c0_148 = arith.constant 0 : index
    %c0_149 = arith.constant 0 : index
    %473 = vector.load %arg16[%472, %c0_148, %c0_149] : memref<8x8x32xf32, #tpu.memory_space<vmem>>, vector<1x8x32xf32>
    %474 = vector.shape_cast %473 : vector<1x8x32xf32> to vector<8x32xf32>
    %475 = vector.shape_cast %471 : vector<8x32xf32> to vector<1x8x32xf32>
    tpu.vector_store %arg16[%472, %c0_148, %c0_149], %475 {strides = array<i32>} : memref<8x8x32xf32, #tpu.memory_space<vmem>>, vector<1x8x32xf32>,
    %c5_i32_150 = arith.constant 5 : i32
    %476 = arith.index_cast %c5_i32_150 : i32 to index
    %c0_151 = arith.constant 0 : index
    %c0_152 = arith.constant 0 : index
    %477 = vector.load %arg15[%476, %c0_151, %c0_152] : memref<8x8x128xf32, #tpu.memory_space<vmem>>, vector<1x8x128xf32>
    %478 = vector.shape_cast %477 : vector<1x8x128xf32> to vector<8x128xf32>
    %cst_153 = arith.constant dense<0.000000e+00> : vector<8x128xf32>
    %479 = tpu.matmul %471, %301, %cst_153 {dimension_numbers = #tpu.dot_dimension_numbers<[1], [0], [0], [1], [0, 0, 1, 1], [], []>} : vector<8x32xf32>, vector<32x128xf32>, vector<8x128xf32> -> vector<8x128xf32>
    %480 = arith.addf %478, %479 : vector<8x128xf32>
    %481 = vector.extract_strided_slice %480 {offsets = [0, 0], sizes = [8, 32], strides = [1, 1]} : vector<8x128xf32> to vector<8x32xf32>
    %482 = arith.negf %481 : vector<8x32xf32>
    %483 = math.exp %482 : vector<8x32xf32>
    %cst_154 = arith.constant 1.000000e+00 : f32
    %484 = vector.broadcast %cst_154 : f32 to vector<8x32xf32>
    %485 = arith.addf %484, %483 : vector<8x32xf32>
    %486 = arith.divf %484, %485 : vector<8x32xf32>
    %487 = vector.extract_strided_slice %480 {offsets = [0, 32], sizes = [8, 32], strides = [1, 1]} : vector<8x128xf32> to vector<8x32xf32>
    %488 = arith.negf %487 : vector<8x32xf32>
    %489 = math.exp %488 : vector<8x32xf32>
    %cst_155 = arith.constant 1.000000e+00 : f32
    %490 = vector.broadcast %cst_155 : f32 to vector<8x32xf32>
    %491 = arith.addf %490, %489 : vector<8x32xf32>
    %492 = arith.divf %490, %491 : vector<8x32xf32>
    %493 = vector.extract_strided_slice %480 {offsets = [0, 64], sizes = [8, 32], strides = [1, 1]} : vector<8x128xf32> to vector<8x32xf32>
    %494 = math.tanh %493 : vector<8x32xf32>
    %495 = vector.extract_strided_slice %480 {offsets = [0, 96], sizes = [8, 32], strides = [1, 1]} : vector<8x128xf32> to vector<8x32xf32>
    %496 = arith.negf %495 : vector<8x32xf32>
    %497 = math.exp %496 : vector<8x32xf32>
    %cst_156 = arith.constant 1.000000e+00 : f32
    %498 = vector.broadcast %cst_156 : f32 to vector<8x32xf32>
    %499 = arith.addf %498, %497 : vector<8x32xf32>
    %500 = arith.divf %498, %499 : vector<8x32xf32>
    %501 = arith.mulf %492, %469 : vector<8x32xf32>
    %502 = arith.mulf %486, %494 : vector<8x32xf32>
    %503 = arith.addf %501, %502 : vector<8x32xf32>
    %504 = math.tanh %503 : vector<8x32xf32>
    %505 = arith.mulf %500, %504 : vector<8x32xf32>
    %506 = arith.index_cast %c5_i32_150 : i32 to index
    %c0_157 = arith.constant 0 : index
    %c0_158 = arith.constant 0 : index
    %507 = vector.load %arg16[%506, %c0_157, %c0_158] : memref<8x8x32xf32, #tpu.memory_space<vmem>>, vector<1x8x32xf32>
    %508 = vector.shape_cast %507 : vector<1x8x32xf32> to vector<8x32xf32>
    %509 = vector.shape_cast %505 : vector<8x32xf32> to vector<1x8x32xf32>
    tpu.vector_store %arg16[%506, %c0_157, %c0_158], %509 {strides = array<i32>} : memref<8x8x32xf32, #tpu.memory_space<vmem>>, vector<1x8x32xf32>,
    %c6_i32_159 = arith.constant 6 : i32
    %510 = arith.index_cast %c6_i32_159 : i32 to index
    %c0_160 = arith.constant 0 : index
    %c0_161 = arith.constant 0 : index
    %511 = vector.load %arg15[%510, %c0_160, %c0_161] : memref<8x8x128xf32, #tpu.memory_space<vmem>>, vector<1x8x128xf32>
    %512 = vector.shape_cast %511 : vector<1x8x128xf32> to vector<8x128xf32>
    %cst_162 = arith.constant dense<0.000000e+00> : vector<8x128xf32>
    %513 = tpu.matmul %505, %301, %cst_162 {dimension_numbers = #tpu.dot_dimension_numbers<[1], [0], [0], [1], [0, 0, 1, 1], [], []>} : vector<8x32xf32>, vector<32x128xf32>, vector<8x128xf32> -> vector<8x128xf32>
    %514 = arith.addf %512, %513 : vector<8x128xf32>
    %515 = vector.extract_strided_slice %514 {offsets = [0, 0], sizes = [8, 32], strides = [1, 1]} : vector<8x128xf32> to vector<8x32xf32>
    %516 = arith.negf %515 : vector<8x32xf32>
    %517 = math.exp %516 : vector<8x32xf32>
    %cst_163 = arith.constant 1.000000e+00 : f32
    %518 = vector.broadcast %cst_163 : f32 to vector<8x32xf32>
    %519 = arith.addf %518, %517 : vector<8x32xf32>
    %520 = arith.divf %518, %519 : vector<8x32xf32>
    %521 = vector.extract_strided_slice %514 {offsets = [0, 32], sizes = [8, 32], strides = [1, 1]} : vector<8x128xf32> to vector<8x32xf32>
    %522 = arith.negf %521 : vector<8x32xf32>
    %523 = math.exp %522 : vector<8x32xf32>
    %cst_164 = arith.constant 1.000000e+00 : f32
    %524 = vector.broadcast %cst_164 : f32 to vector<8x32xf32>
    %525 = arith.addf %524, %523 : vector<8x32xf32>
    %526 = arith.divf %524, %525 : vector<8x32xf32>
    %527 = vector.extract_strided_slice %514 {offsets = [0, 64], sizes = [8, 32], strides = [1, 1]} : vector<8x128xf32> to vector<8x32xf32>
    %528 = math.tanh %527 : vector<8x32xf32>
    %529 = vector.extract_strided_slice %514 {offsets = [0, 96], sizes = [8, 32], strides = [1, 1]} : vector<8x128xf32> to vector<8x32xf32>
    %530 = arith.negf %529 : vector<8x32xf32>
    %531 = math.exp %530 : vector<8x32xf32>
    %cst_165 = arith.constant 1.000000e+00 : f32
    %532 = vector.broadcast %cst_165 : f32 to vector<8x32xf32>
    %533 = arith.addf %532, %531 : vector<8x32xf32>
    %534 = arith.divf %532, %533 : vector<8x32xf32>
    %535 = arith.mulf %526, %503 : vector<8x32xf32>
    %536 = arith.mulf %520, %528 : vector<8x32xf32>
    %537 = arith.addf %535, %536 : vector<8x32xf32>
    %538 = math.tanh %537 : vector<8x32xf32>
    %539 = arith.mulf %534, %538 : vector<8x32xf32>
    %540 = arith.index_cast %c6_i32_159 : i32 to index
    %c0_166 = arith.constant 0 : index
    %c0_167 = arith.constant 0 : index
    %541 = vector.load %arg16[%540, %c0_166, %c0_167] : memref<8x8x32xf32, #tpu.memory_space<vmem>>, vector<1x8x32xf32>
    %542 = vector.shape_cast %541 : vector<1x8x32xf32> to vector<8x32xf32>
    %543 = vector.shape_cast %539 : vector<8x32xf32> to vector<1x8x32xf32>
    tpu.vector_store %arg16[%540, %c0_166, %c0_167], %543 {strides = array<i32>} : memref<8x8x32xf32, #tpu.memory_space<vmem>>, vector<1x8x32xf32>,
    %c7_i32_168 = arith.constant 7 : i32
    %544 = arith.index_cast %c7_i32_168 : i32 to index
    %c0_169 = arith.constant 0 : index
    %c0_170 = arith.constant 0 : index
    %545 = vector.load %arg15[%544, %c0_169, %c0_170] : memref<8x8x128xf32, #tpu.memory_space<vmem>>, vector<1x8x128xf32>
    %546 = vector.shape_cast %545 : vector<1x8x128xf32> to vector<8x128xf32>
    %cst_171 = arith.constant dense<0.000000e+00> : vector<8x128xf32>
    %547 = tpu.matmul %539, %301, %cst_171 {dimension_numbers = #tpu.dot_dimension_numbers<[1], [0], [0], [1], [0, 0, 1, 1], [], []>} : vector<8x32xf32>, vector<32x128xf32>, vector<8x128xf32> -> vector<8x128xf32>
    %548 = arith.addf %546, %547 : vector<8x128xf32>
    %549 = vector.extract_strided_slice %548 {offsets = [0, 0], sizes = [8, 32], strides = [1, 1]} : vector<8x128xf32> to vector<8x32xf32>
    %550 = arith.negf %549 : vector<8x32xf32>
    %551 = math.exp %550 : vector<8x32xf32>
    %cst_172 = arith.constant 1.000000e+00 : f32
    %552 = vector.broadcast %cst_172 : f32 to vector<8x32xf32>
    %553 = arith.addf %552, %551 : vector<8x32xf32>
    %554 = arith.divf %552, %553 : vector<8x32xf32>
    %555 = vector.extract_strided_slice %548 {offsets = [0, 32], sizes = [8, 32], strides = [1, 1]} : vector<8x128xf32> to vector<8x32xf32>
    %556 = arith.negf %555 : vector<8x32xf32>
    %557 = math.exp %556 : vector<8x32xf32>
    %cst_173 = arith.constant 1.000000e+00 : f32
    %558 = vector.broadcast %cst_173 : f32 to vector<8x32xf32>
    %559 = arith.addf %558, %557 : vector<8x32xf32>
    %560 = arith.divf %558, %559 : vector<8x32xf32>
    %561 = vector.extract_strided_slice %548 {offsets = [0, 64], sizes = [8, 32], strides = [1, 1]} : vector<8x128xf32> to vector<8x32xf32>
    %562 = math.tanh %561 : vector<8x32xf32>
    %563 = vector.extract_strided_slice %548 {offsets = [0, 96], sizes = [8, 32], strides = [1, 1]} : vector<8x128xf32> to vector<8x32xf32>
    %564 = arith.negf %563 : vector<8x32xf32>
    %565 = math.exp %564 : vector<8x32xf32>
    %cst_174 = arith.constant 1.000000e+00 : f32
    %566 = vector.broadcast %cst_174 : f32 to vector<8x32xf32>
    %567 = arith.addf %566, %565 : vector<8x32xf32>
    %568 = arith.divf %566, %567 : vector<8x32xf32>
    %569 = arith.mulf %560, %537 : vector<8x32xf32>
    %570 = arith.mulf %554, %562 : vector<8x32xf32>
    %571 = arith.addf %569, %570 : vector<8x32xf32>
    %572 = math.tanh %571 : vector<8x32xf32>
    %573 = arith.mulf %568, %572 : vector<8x32xf32>
    %574 = arith.index_cast %c7_i32_168 : i32 to index
    %c0_175 = arith.constant 0 : index
    %c0_176 = arith.constant 0 : index
    %575 = vector.load %arg16[%574, %c0_175, %c0_176] : memref<8x8x32xf32, #tpu.memory_space<vmem>>, vector<1x8x32xf32>
    %576 = vector.shape_cast %575 : vector<1x8x32xf32> to vector<8x32xf32>
    %577 = vector.shape_cast %573 : vector<8x32xf32> to vector<1x8x32xf32>
    tpu.vector_store %arg16[%574, %c0_175, %c0_176], %577 {strides = array<i32>} : memref<8x8x32xf32, #tpu.memory_space<vmem>>, vector<1x8x32xf32>,
    %c8_i32_177 = arith.constant 8 : i32
    %c1_178 = arith.constant 1 : index
    %c0_179 = arith.constant 0 : index
    %c0_180 = arith.constant 0 : index
    %578 = vector.load %arg13[%c1_178, %c0_179, %c0_180] : memref<2x8x32xf32, #tpu.memory_space<vmem>>, vector<1x8x32xf32>
    %579 = vector.shape_cast %578 : vector<1x8x32xf32> to vector<8x32xf32>
    %580 = vector.shape_cast %573 : vector<8x32xf32> to vector<1x8x32xf32>
    tpu.vector_store %arg13[%c1_178, %c0_179, %c0_180], %580 {strides = array<i32>} : memref<2x8x32xf32, #tpu.memory_space<vmem>>, vector<1x8x32xf32>,
    %c1_181 = arith.constant 1 : index
    %c0_182 = arith.constant 0 : index
    %c0_183 = arith.constant 0 : index
    %581 = vector.load %arg14[%c1_181, %c0_182, %c0_183] : memref<2x8x32xf32, #tpu.memory_space<vmem>>, vector<1x8x32xf32>
    %582 = vector.shape_cast %581 : vector<1x8x32xf32> to vector<8x32xf32>
    %583 = vector.shape_cast %571 : vector<8x32xf32> to vector<1x8x32xf32>
    tpu.vector_store %arg14[%c1_181, %c0_182, %c0_183], %583 {strides = array<i32>} : memref<2x8x32xf32, #tpu.memory_space<vmem>>, vector<1x8x32xf32>,
    %c0_184 = arith.constant 0 : index
    %c0_185 = arith.constant 0 : index
    %c0_186 = arith.constant 0 : index
    %584 = vector.load %arg16[%c0_184, %c0_185, %c0_186] : memref<8x8x32xf32, #tpu.memory_space<vmem>>, vector<8x8x32xf32>
    %585 = vector.shape_cast %584 : vector<8x8x32xf32> to vector<64x32xf32>
    %c0_187 = arith.constant 0 : index
    %c0_188 = arith.constant 0 : index
    %586 = vector.load %arg10[%c0_187, %c0_188] : memref<32x128xf32, #tpu.memory_space<vmem>>, vector<32x128xf32>
    %cst_189 = arith.constant dense<0.000000e+00> : vector<64x128xf32>
    %587 = tpu.matmul %585, %586, %cst_189 {dimension_numbers = #tpu.dot_dimension_numbers<[1], [0], [0], [1], [0, 0, 1, 1], [], []>} : vector<64x32xf32>, vector<32x128xf32>, vector<64x128xf32> -> vector<64x128xf32>
    %c0_190 = arith.constant 0 : index
    %c0_191 = arith.constant 0 : index
    %588 = vector.load %arg11[%c0_190, %c0_191] : memref<1x128xf32, #tpu.memory_space<vmem>>, vector<1x128xf32>
    %589 = vector.broadcast %588 : vector<1x128xf32> to vector<64x128xf32>
    %590 = arith.addf %587, %589 : vector<64x128xf32>
    %591 = vector.shape_cast %590 : vector<64x128xf32> to vector<8x8x128xf32>
    %c0_192 = arith.constant 0 : index
    %c0_193 = arith.constant 0 : index
    %c0_194 = arith.constant 0 : index
    %592 = vector.load %arg12[%c0_192, %c0_193, %c0_194] : memref<8x8x128xf32, #tpu.memory_space<vmem>>, vector<8x8x128xf32>
    tpu.vector_store %arg12[%c0_192, %c0_193, %c0_194], %591 {strides = array<i32>} : memref<8x8x128xf32, #tpu.memory_space<vmem>>, vector<8x8x128xf32>,
    return
  }
  func.func @transform_0(%arg0: i32) -> (i32, i32, i32) {
    %c0_i32 = arith.constant 0 : i32
    %c0_i32_0 = arith.constant 0 : i32
    %c0_i32_1 = arith.constant 0 : i32
    return %c0_i32, %arg0, %c0_i32_0 : i32, i32, i32
  }
  func.func @transform_1(%arg0: i32) -> (i32, i32, i32) {
    %c0_i32 = arith.constant 0 : i32
    %c0_i32_0 = arith.constant 0 : i32
    %c0_i32_1 = arith.constant 0 : i32
    return %c0_i32, %arg0, %c0_i32_0 : i32, i32, i32
  }
  func.func @transform_2(%arg0: i32) -> (i32, i32, i32) {
    %c0_i32 = arith.constant 0 : i32
    %c0_i32_0 = arith.constant 0 : i32
    %c0_i32_1 = arith.constant 0 : i32
    return %c0_i32, %arg0, %c0_i32_0 : i32, i32, i32
  }
  func.func @transform_3(%arg0: i32) -> (i32, i32) {
    %c0_i32 = arith.constant 0 : i32
    %c0_i32_0 = arith.constant 0 : i32
    %c0_i32_1 = arith.constant 0 : i32
    return %c0_i32, %c0_i32_0 : i32, i32
  }
  func.func @transform_4(%arg0: i32) -> (i32, i32) {
    %c0_i32 = arith.constant 0 : i32
    %c0_i32_0 = arith.constant 0 : i32
    %c0_i32_1 = arith.constant 0 : i32
    return %c0_i32, %c0_i32_0 : i32, i32
  }
  func.func @transform_5(%arg0: i32) -> (i32, i32) {
    %c0_i32 = arith.constant 0 : i32
    %c0_i32_0 = arith.constant 0 : i32
    %c0_i32_1 = arith.constant 0 : i32
    return %c0_i32, %c0_i32_0 : i32, i32
  }
  func.func @transform_6(%arg0: i32) -> (i32, i32) {
    %c0_i32 = arith.constant 0 : i32
    %c0_i32_0 = arith.constant 0 : i32
    %c0_i32_1 = arith.constant 0 : i32
    return %c0_i32, %c0_i32_0 : i32, i32
  }
  func.func @transform_7(%arg0: i32) -> (i32, i32) {
    %c0_i32 = arith.constant 0 : i32
    %c0_i32_0 = arith.constant 0 : i32
    %c0_i32_1 = arith.constant 0 : i32
    return %c0_i32, %c0_i32_0 : i32, i32
  }
  func.func @transform_8(%arg0: i32) -> (i32, i32) {
    %c0_i32 = arith.constant 0 : i32
    %c0_i32_0 = arith.constant 0 : i32
    %c0_i32_1 = arith.constant 0 : i32
    return %c0_i32, %c0_i32_0 : i32, i32
  }
  func.func @transform_9(%arg0: i32) -> (i32, i32) {
    %c0_i32 = arith.constant 0 : i32
    %c0_i32_0 = arith.constant 0 : i32
    %c0_i32_1 = arith.constant 0 : i32
    return %c0_i32, %c0_i32_0 : i32, i32
  }
  func.func @transform_10(%arg0: i32) -> (i32, i32) {
    %c0_i32 = arith.constant 0 : i32
    %c0_i32_0 = arith.constant 0 : i32
    %c0_i32_1 = arith.constant 0 : i32
    return %c0_i32, %c0_i32_0 : i32, i32
  }
  func.func @transform_11(%arg0: i32) -> (i32, i32, i32) {
    %c0_i32 = arith.constant 0 : i32
    %c0_i32_0 = arith.constant 0 : i32
    %c0_i32_1 = arith.constant 0 : i32
    return %c0_i32, %arg0, %c0_i32_0 : i32, i32, i32
  }
  func.func @transform_12(%arg0: i32) -> (i32, i32, i32) {
    %c0_i32 = arith.constant 0 : i32
    %c0_i32_0 = arith.constant 0 : i32
    %c0_i32_1 = arith.constant 0 : i32
    return %c0_i32, %arg0, %c0_i32_0 : i32, i32, i32
  }
  func.func @transform_13(%arg0: i32) -> (i32, i32, i32) {
    %c0_i32 = arith.constant 0 : i32
    %c0_i32_0 = arith.constant 0 : i32
    %c0_i32_1 = arith.constant 0 : i32
    return %c0_i32, %arg0, %c0_i32_0 : i32, i32, i32
  }
}

</mosaic_0001>

<bundles_post_ra>
// kernel: _forward_impl.1
= control target key start
LH: loop header
LB: loop body
LE: loop exit
PB: predicated region body
PF: predicated region fallthrough
CT: control target
= control target key end

     0   :  { %vm60_vm0 = vcmask 261120   ;;  %v2895_v13 = vmov 0.0|0.0   ;;  %vm2896_vm1 = vmmov 0   ;;  %v2897_v19 = vmov 0.0   ;;  %s2898_s21 = smov 64   ;;  %s3417_s3 = inlined_call_operand.vmem [shape: f32[32,128], index: 3, kind: input, shape index: {}]   ;;  %s3418_s0 = inlined_call_operand.vmem [shape: f32[8,8,32], index: 0, kind: input, shape index: {}]   ;;  %s3419_s4 = inlined_call_operand.vmem [shape: f32[32,128], index: 4, kind: input, shape index: {}]   ;;  %s3420_s1 = inlined_call_operand.vmem [shape: f32[2,8,32], index: 1, kind: input, shape index: {}, may-alias: {1,12}]   ;;  %s3421_s5 = inlined_call_operand.vmem [shape: f32[1,128], index: 5, kind: input, shape index: {}]   ;;  %s3422_s2 = inlined_call_operand.vmem [shape: f32[2,8,32], index: 2, kind: input, shape index: {}, may-alias: {2,13}]   ;;  %s3423_s6 = inlined_call_operand.vmem [shape: f32[32,128], index: 6, kind: input, shape index: {}]   ;;  %s3424_s7 = inlined_call_operand.vmem [shape: f32[32,128], index: 7, kind: input, shape index: {}]   ;;  %s3425_s8 = inlined_call_operand.vmem [shape: f32[1,128], index: 8, kind: input, shape index: {}]   ;;  %s3426_s12 = inlined_call_operand.vmem [shape: f32[2,8,32], index: 12, kind: output, shape index: {1}, may-alias: {1,12}]   ;;  %s3427_s9 = inlined_call_operand.vmem [shape: f32[32,128], index: 9, kind: input, shape index: {}]   ;;  %s3428_s10 = inlined_call_operand.vmem [shape: f32[1,128], index: 10, kind: input, shape index: {}]   ;;  %s3429_s11 = inlined_call_operand.vmem [shape: f32[8,8,128], index: 11, kind: output, shape index: {0}]   ;;  %s3430_s13 = inlined_call_operand.vmem [shape: f32[2,8,32], index: 13, kind: output, shape index: {2}, may-alias: {2,13}]  }
   0x1   :  { %v49_v0 = vld [vmem:[%s3417_s3] sm:$0xff]  ;;  %v50_v1 = vld [vmem:[%s3417_s3 + $0x8] sm:$0xff]  ;;  %v51_v2 = vld [vmem:[%s3417_s3 + $0x10] sm:$0xff] }
   0x2   :  { %v2637_v3 = vpack.c.bf16 %v50_v1, %v49_v0  ;;  %v52_v4 = vld [vmem:[%s3417_s3 + $0x18] sm:$0xff]  ;;  %v45_v5 = vld [vmem:[%s3418_s0 + $0x20] sm:$0xff]  ;;  %v199_v9 = vld [vmem:[%s3419_s4 + $0x8] sm:$0xff] }
   0x3   :  { %v2641_v6 = vpack.c.bf16 %v52_v4, %v51_v2  ;;  %2415 = vmatprep.mubr.msk.f32.mxu1 %vm60_vm0, %v45_v5  ;;  %v41_v7 = vld [vmem:[%s3418_s0] sm:$0xff]  ;;  %v46_v10 = vld [vmem:[%s3418_s0 + $0x28] sm:$0xff]  ;;  %v47_v14 = vld [vmem:[%s3418_s0 + $0x30] sm:$0xff] }
   0x4   :  { %2757 = vmatprep.subr.bf16.mxu1 %v2637_v3  ;;  %2638 = vmatprep.subr.bf16.mxu0 %v2637_v3  ;;  %v198_v8 = vld [vmem:[%s3419_s4] sm:$0xff]  ;;  %v42_v12 = vld [vmem:[%s3418_s0 + $0x8] sm:$0xff]  ;;  %v200_v15 = vld [vmem:[%s3419_s4 + $0x10] sm:$0xff] }
   0x5   :  { %2759 = vmatpush3.bf16.msra.mxu1 %v2637_v3  ;;  %2640 = vmatpush3.bf16.msra.mxu0 %v2637_v3  ;;  %v3000_v11 = vpack.c.bf16 %v199_v9, %v198_v8  ;;  %v201_v16 = vld [vmem:[%s3419_s4 + $0x18] sm:$0xff]  ;;  %v202_v20 = vld [vmem:[%s3420_s1] sm:$0xff]  ;;  %v43_v62 = vld [vmem:[%s3418_s0 + $0x10] sm:$0xff] }
   0x6   :  { %2758 = vmatprep.subr.bf16.mxu1 %v2641_v6  ;;  %2642 = vmatprep.subr.bf16.mxu0 %v2641_v6  ;;  %v48_v17 = vld [vmem:[%s3418_s0 + $0x38] sm:$0xff]  ;;  %v3023_v18 = vpack.c.bf16 %v201_v16, %v200_v15  ;;  %v3052_v25 = vld [vmem:[%s3421_s5] ss:$0 sm:$0xff]  ;;  %s2899_s5 = smov 32  }
   0x7   :  { %2409 = vmatprep.mubr.msk.f32.mxu0 %vm60_vm0, %v41_v7  ;;  %v203_v33 = vld [vmem:[%s3422_s2] sm:$0xff]  ;;  %v44_v63 = vld [vmem:[%s3418_s0 + $0x18] sm:$0xff] }
   0x9   :  { %2760 = vmatpush3.bf16.msra.mxu1 %v2641_v6  ;;  %2644 = vmatpush3.bf16.msra.mxu0 %v2641_v6 }
   0xa   :  { %2645 = vmatprep.subr.bf16.mxu1 %v2895_v13  ;;  %2657 = vmatprep.subr.bf16.mxu0 %v2895_v13 }
   0xc   :  { %2416 = vmatmul.mubr.msk.f32.vlgmr.msra.gmra.mrb[0].mxu1 %vm60_vm0, %v46_v10  ;;  %2410 = vmatmul.mubr.msk.f32.vlgmr.msra.gmra.mrb[0].mxu0 %vm60_vm0, %v42_v12 }
   0xd   :  { %2647 = vmatpush3.bf16.msra.mxu1 %v3000_v11  ;;  %2418 = vmatprep.mubr.msk.f32.mxu1 %vm60_vm0, %v47_v14 }
   0xe   :  { %2648 = vmatprep.subr.bf16.mxu1 %v2895_v13  ;;  %2659 = vmatpush3.bf16.msra.mxu0 %v3000_v11 }
   0xf   :  { %2660 = vmatprep.subr.bf16.mxu0 %v2895_v13  ;;  %2412 = vmatprep.mubr.msk.f32.mxu0 %vm60_vm0, %v43_v62 }
  0x10   :  { %2419 = vmatmul.mubr.msk.f32.gmra.mrb[2].mxu1 %vm60_vm0, %v48_v17  ;;  %2413 = vmatmul.mubr.msk.f32.gmra.mrb[2].mxu0 %vm60_vm0, %v44_v63 }
  0x11   :  { %2650 = vmatpush3.bf16.msra.mxu1 %v3023_v18  ;;  %2429 = vmatprep.mubr.msk.f32.mxu1 %vm2896_vm1, %v2897_v19 }
  0x12   :  { %2651 = vmatprep.subr.bf16.mxu1 %v2895_v13  ;;  %2662 = vmatpush3.bf16.msra.mxu0 %v3023_v18 }
  0x13   :  { %2669 = vmatprep.subr.bf16.mxu0 %v2895_v13  ;;  %2451 = vmatprep.mubr.msk.f32.mxu0 %vm2896_vm1, %v2897_v19 }
  0x14   :  { %2430 = vmatmul.mubr.msk.f32.vlgmr.msra.gmra.mrb[4].mxu1 %vm60_vm0, %v202_v20 }
  0x15   :  { %2653 = vmatpush3.bf16.msra.mxu1 %v3000_v11  ;;  %2440 = vmatprep.mubr.msk.f32.mxu1 %vm2896_vm1, %v2897_v19 }
  0x16   :  { %2654 = vmatprep.subr.bf16.mxu1 %v2895_v13 }
  0x19   :  { %2656 = vmatpush3.bf16.msra.mxu1 %v3023_v18 }
  0x1a   :  { %2663 = vmatprep.subr.bf16.mxu1 %v2895_v13 }
  0xdf   :  { %v3045_v21 = vpop.f32.mrb[0].mxu1  ;;  %v2411_v22 = vpop.f32.mrb[0].mxu0 }
  0xe0   :  { %v3047_v23 = vpop.f32.mrb[1].mxu1  ;;  %v151_v24 = vpop.f32.mrb[1].mxu0  ;;  %v157_v48 = vadd.f32 %v2411_v22, %v3052_v25 }
  0xe1   :  { %v152_v28 = vadd.f32 %v3052_v25, %v151_v24 }
  0xe3   :  { %v3054_v26 = vpop.f32.mrb[2].mxu1  ;;  %v2414_v3 = vpop.f32.mrb[2].mxu0 }
  0xe4   :  { %v3056_v27 = vpop.f32.mrb[3].mxu1  ;;  %v161_v4 = vpop.f32.mrb[3].mxu0 }
  0xe5   :  { %v162_v6 = vadd.f32 %v3052_v25, %v161_v4  ;;  %v177_v4 = vadd.f32 %v3045_v21, %v3052_v25 }
  0xe7   :  { %v274_v29 = vpop.f32.mrb[4].mxu1 }
  0xe8   :  { %v278_v30 = vadd.f32 %v274_v29, %v152_v28  ;;  %v2431_v31 = vpop.f32.mrb[5].mxu1 }
  0xea   :  { %2767 = vtanh.f32 %v278_v30  ;;  %v2232_v34 = vmul.f32 -1.442695, %v278_v30 }
  0xec   :  { %2769 = vpow2.f32 %v2232_v34 }
  0xf4   :  { %v2768_v32 = vpop.eup %2767 }
  0xf5   :  { %292 = vrot.lane.b32.xlu0 %v2768_v32, %s2898_s21 }
  0xf6   :  { %v2770_v35 = vpop.eup %2769 }
  0xf7   :  { %v282_v36 = vadd.f32 1.0, %v2770_v35 }
  0xf9   :  { %287 = vrot.lane.b32.xlu0 %v203_v33, %s2899_s5  ;;  %2771 = vrcp.f32 %v282_v36  ;;  %v167_v33 = vadd.f32 %v2414_v3, %v3052_v25 }
 0x103   :  { %v2772_v37 = vpop.eup %2771 }
 0x167   :  { %v293_v38 = vpop.permute.xlu0 %292 }
 0x168   :  { %v295_v39 = vmul.f32 %v2772_v37, %v293_v38 }
 0x16a   :  { %297 = vrot.lane.b32.xlu1 %v295_v39, %s2899_s5 }
 0x16b   :  { %v288_v40 = vpop.permute.xlu0 %287 }
 0x16c   :  { %v290_v41 = vmul.f32 %v2772_v37, %v288_v40 }
 0x1dc   :  { %v298_v42 = vpop.permute.xlu1 %297 }
 0x1dd   :  { %v300_v43 = vadd.f32 %v298_v42, %v290_v41 }
 0x1df   :  { %2773 = vtanh.f32 %v300_v43 }
 0x1e9   :  { %v2774_v44 = vpop.eup %2773 }
 0x1ea   :  { %303 = vrot.lane.b32.xlu1 %v2774_v44, %s2898_s21 }
 0x25c   :  { %v304_v45 = vpop.permute.xlu1 %303 }
 0x25d   :  { %v306_v46 = vmul.f32 %v2772_v37, %v304_v45 }
 0x25f   :  { %308 = vrot.lane.b32.xlu0 %v306_v46, %s2899_s5 }
 0x2d1   :  { %v309_v47 = vpop.permute.xlu0 %308 }
 0x2d2   :  { %311 = vst.msk [vmem:[#allocation3] sm:$0xff] %vm60_vm0, %v309_v47  ;;  %2441 = vmatmul.mubr.msk.f32.vlgmr.msra.gmra.mrb[6].mxu1 %vm60_vm0, %v309_v47 }
 0x2d3   :  { %2665 = vmatpush3.bf16.msra.mxu1 %v3000_v11  ;;  %2462 = vmatprep.mubr.msk.f32.mxu1 %vm2896_vm1, %v2897_v19 }
 0x2d4   :  { %2666 = vmatprep.subr.bf16.mxu1 %v2895_v13 }
 0x2d7   :  { %2668 = vmatpush3.bf16.msra.mxu1 %v3023_v18 }
 0x2d8   :  { %2675 = vmatprep.subr.bf16.mxu1 %v2895_v13 }
 0x3a5   :  { %v382_v49 = vpop.f32.mrb[6].mxu1 }
 0x3a6   :  { %v386_v50 = vadd.f32 %v382_v49, %v157_v48  ;;  %v2442_v51 = vpop.f32.mrb[7].mxu1 }
 0x3a7   :  { %v172_v51 = vadd.f32 %v3052_v25, %v3047_v23 }
 0x3a8   :  { %2775 = vtanh.f32 %v386_v50  ;;  %v2234_v53 = vmul.f32 -1.442695, %v386_v50 }
 0x3aa   :  { %2777 = vpow2.f32 %v2234_v53 }
 0x3b2   :  { %v2776_v52 = vpop.eup %2775 }
 0x3b3   :  { %396 = vrot.lane.b32.xlu1 %v2776_v52, %s2898_s21 }
 0x3b4   :  { %v2778_v54 = vpop.eup %2777 }
 0x3b5   :  { %v390_v55 = vadd.f32 1.0, %v2778_v54 }
 0x3b7   :  { %2779 = vrcp.f32 %v390_v55 }
 0x3c1   :  { %v2780_v56 = vpop.eup %2779 }
 0x3c2   :  { %v394_v59 = vmul.f32 %v2780_v56, %v300_v43 }
 0x425   :  { %v397_v57 = vpop.permute.xlu1 %396 }
 0x426   :  { %v399_v58 = vmul.f32 %v2780_v56, %v397_v57 }
 0x428   :  { %401 = vrot.lane.b32.xlu0 %v399_v58, %s2899_s5 }
 0x49a   :  { %v402_v60 = vpop.permute.xlu0 %401 }
 0x49b   :  { %v404_v61 = vadd.f32 %v402_v60, %v394_v59 }
 0x49d   :  { %2781 = vtanh.f32 %v404_v61 }
 0x4a7   :  { %v2782_v0 = vpop.eup %2781 }
 0x4a8   :  { %407 = vrot.lane.b32.xlu1 %v2782_v0, %s2898_s21 }
 0x51a   :  { %v408_v1 = vpop.permute.xlu1 %407 }
 0x51b   :  { %v410_v2 = vmul.f32 %v2780_v56, %v408_v1 }
 0x51d   :  { %412 = vrot.lane.b32.xlu0 %v410_v2, %s2899_s5 }
 0x58f   :  { %v413_v5 = vpop.permute.xlu0 %412 }
 0x590   :  { %416 = vst.msk [vmem:[#allocation3 + $0x8] sm:$0xff] %vm60_vm0, %v413_v5  ;;  %2452 = vmatmul.mubr.msk.f32.vlgmr.msra.gmra.mrb[4].mxu0 %vm60_vm0, %v413_v5 }
 0x591   :  { %2671 = vmatpush3.bf16.msra.mxu0 %v3000_v11  ;;  %2473 = vmatprep.mubr.msk.f32.mxu0 %vm2896_vm1, %v2897_v19 }
 0x592   :  { %2672 = vmatprep.subr.bf16.mxu0 %v2895_v13 }
 0x595   :  { %2674 = vmatpush3.bf16.msra.mxu0 %v3023_v18 }
 0x596   :  { %2681 = vmatprep.subr.bf16.mxu0 %v2895_v13 }
 0x663   :  { %v487_v7 = vpop.f32.mrb[4].mxu0 }
 0x664   :  { %v491_v8 = vadd.f32 %v487_v7, %v162_v6  ;;  %v2453_v9 = vpop.f32.mrb[5].mxu0 }
 0x666   :  { %2783 = vtanh.f32 %v491_v8  ;;  %v2236_v12 = vmul.f32 -1.442695, %v491_v8 }
 0x668   :  { %2785 = vpow2.f32 %v2236_v12 }
 0x670   :  { %v2784_v10 = vpop.eup %2783 }
 0x671   :  { %501 = vrot.lane.b32.xlu1 %v2784_v10, %s2898_s21 }
 0x672   :  { %v2786_v14 = vpop.eup %2785 }
 0x673   :  { %v495_v15 = vadd.f32 1.0, %v2786_v14 }
 0x675   :  { %2787 = vrcp.f32 %v495_v15 }
 0x67f   :  { %v2788_v16 = vpop.eup %2787 }
 0x680   :  { %v499_v22 = vmul.f32 %v2788_v16, %v404_v61 }
 0x6e3   :  { %v502_v17 = vpop.permute.xlu1 %501 }
 0x6e4   :  { %v504_v20 = vmul.f32 %v2788_v16, %v502_v17  ;;  %v1061_v17 = vld [vmem:[%s3423_s6] sm:$0xff] }
 0x6e6   :  { %506 = vrot.lane.b32.xlu0 %v504_v20, %s2899_s5  ;;  %v1062_v20 = vld [vmem:[%s3423_s6 + $0x8] sm:$0xff] }
 0x758   :  { %v507_v24 = vpop.permute.xlu0 %506 }
 0x759   :  { %v509_v28 = vadd.f32 %v507_v24, %v499_v22  ;;  %v2693_v22 = vpack.c.bf16 %v1062_v20, %v1061_v17 }
 0x75b   :  { %2789 = vtanh.f32 %v509_v28 }
 0x765   :  { %v2790_v29 = vpop.eup %2789 }
 0x766   :  { %512 = vrot.lane.b32.xlu1 %v2790_v29, %s2898_s21 }
 0x7d8   :  { %v513_v30 = vpop.permute.xlu1 %512 }
 0x7d9   :  { %v515_v31 = vmul.f32 %v2788_v16, %v513_v30  ;;  %v1063_v30 = vld [vmem:[%s3423_s6 + $0x10] sm:$0xff] }
 0x7db   :  { %517 = vrot.lane.b32.xlu0 %v515_v31, %s2899_s5  ;;  %v1064_v31 = vld [vmem:[%s3423_s6 + $0x18] sm:$0xff] }
 0x84d   :  { %v518_v32 = vpop.permute.xlu0 %517 }
 0x84e   :  { %521 = vst.msk [vmem:[#allocation3 + $0x10] sm:$0xff] %vm60_vm0, %v518_v32  ;;  %2463 = vmatmul.mubr.msk.f32.vlgmr.msra.gmra.mrb[8].mxu1 %vm60_vm0, %v518_v32  ;;  %v2697_v32 = vpack.c.bf16 %v1064_v31, %v1063_v30 }
 0x84f   :  { %2677 = vmatpush3.bf16.msra.mxu1 %v3000_v11  ;;  %2484 = vmatprep.mubr.msk.f32.mxu1 %vm2896_vm1, %v2897_v19 }
 0x850   :  { %2678 = vmatprep.subr.bf16.mxu1 %v2895_v13 }
 0x853   :  { %2680 = vmatpush3.bf16.msra.mxu1 %v3023_v18 }
 0x854   :  { %2687 = vmatprep.subr.bf16.mxu1 %v2895_v13 }
 0x921   :  { %v592_v34 = vpop.f32.mrb[8].mxu1 }
 0x922   :  { %v596_v35 = vadd.f32 %v592_v34, %v167_v33  ;;  %v2464_v36 = vpop.f32.mrb[9].mxu1  ;;  %v1053_v34 = vld [vmem:[#allocation3] sm:$0xff] }
 0x923   :  { %v1055_v36 = vld [vmem:[#allocation3 + $0x10] sm:$0xff] }
 0x924   :  { %2791 = vtanh.f32 %v596_v35  ;;  %v2238_v38 = vmul.f32 -1.442695, %v596_v35  ;;  %v1054_v35 = vld [vmem:[#allocation3 + $0x8] sm:$0xff] }
 0x926   :  { %2793 = vpow2.f32 %v2238_v38 }
 0x92e   :  { %v2792_v37 = vpop.eup %2791 }
 0x92f   :  { %606 = vrot.lane.b32.xlu1 %v2792_v37, %s2898_s21 }
 0x930   :  { %v2794_v39 = vpop.eup %2793 }
 0x931   :  { %v600_v40 = vadd.f32 1.0, %v2794_v39 }
 0x933   :  { %2795 = vrcp.f32 %v600_v40  ;;  %v182_v40 = vadd.f32 %v3052_v25, %v3056_v27 }
 0x93d   :  { %v2796_v41 = vpop.eup %2795 }
 0x93e   :  { %v604_v44 = vmul.f32 %v2796_v41, %v509_v28 }
 0x9a1   :  { %v607_v42 = vpop.permute.xlu1 %606 }
 0x9a2   :  { %v609_v43 = vmul.f32 %v2796_v41, %v607_v42 }
 0x9a4   :  { %611 = vrot.lane.b32.xlu0 %v609_v43, %s2899_s5 }
 0xa16   :  { %v612_v45 = vpop.permute.xlu0 %611 }
 0xa17   :  { %v614_v46 = vadd.f32 %v612_v45, %v604_v44 }
 0xa19   :  { %2797 = vtanh.f32 %v614_v46 }
 0xa23   :  { %v2798_v47 = vpop.eup %2797 }
 0xa24   :  { %617 = vrot.lane.b32.xlu1 %v2798_v47, %s2898_s21 }
 0xa96   :  { %v618_v48 = vpop.permute.xlu1 %617 }
 0xa97   :  { %v620_v49 = vmul.f32 %v2796_v41, %v618_v48 }
 0xa99   :  { %622 = vrot.lane.b32.xlu0 %v620_v49, %s2899_s5 }
 0xb0b   :  { %v623_v50 = vpop.permute.xlu0 %622 }
 0xb0c   :  { %626 = vst.msk [vmem:[#allocation3 + $0x18] sm:$0xff] %vm60_vm0, %v623_v50  ;;  %2474 = vmatmul.mubr.msk.f32.vlgmr.msra.gmra.mrb[6].mxu0 %vm60_vm0, %v623_v50 }
 0xb0d   :  { %2683 = vmatpush3.bf16.msra.mxu0 %v3000_v11  ;;  %2495 = vmatprep.mubr.msk.f32.mxu0 %vm2896_vm1, %v2897_v19 }
 0xb0e   :  { %2684 = vmatprep.subr.bf16.mxu0 %v2895_v13 }
 0xb11   :  { %2686 = vmatpush3.bf16.msra.mxu0 %v3023_v18 }
 0xb12   :  { %2694 = vmatprep.subr.bf16.mxu0 %v2693_v22 }
 0xb13   :  { %v1056_v37 = vld [vmem:[#allocation3 + $0x18] sm:$0xff] }
 0xbdf   :  { %v697_v52 = vpop.f32.mrb[6].mxu0 }
 0xbe0   :  { %v701_v53 = vadd.f32 %v697_v52, %v172_v51  ;;  %v2475_v54 = vpop.f32.mrb[7].mxu0 }
 0xbe2   :  { %2799 = vtanh.f32 %v701_v53  ;;  %v2240_v56 = vmul.f32 -1.442695, %v701_v53 }
 0xbe4   :  { %2801 = vpow2.f32 %v2240_v56 }
 0xbec   :  { %v2800_v55 = vpop.eup %2799 }
 0xbed   :  { %711 = vrot.lane.b32.xlu1 %v2800_v55, %s2898_s21 }
 0xbee   :  { %v2802_v57 = vpop.eup %2801 }
 0xbef   :  { %v705_v58 = vadd.f32 1.0, %v2802_v57 }
 0xbf1   :  { %2803 = vrcp.f32 %v705_v58 }
 0xbfb   :  { %v2804_v59 = vpop.eup %2803 }
 0xbfc   :  { %v709_v62 = vmul.f32 %v2804_v59, %v614_v46 }
 0xc5f   :  { %v712_v60 = vpop.permute.xlu1 %711 }
 0xc60   :  { %v714_v61 = vmul.f32 %v2804_v59, %v712_v60  ;;  %v1209_v60 = vld [vmem:[%s3424_s7] sm:$0xff] }
 0xc62   :  { %716 = vrot.lane.b32.xlu0 %v714_v61, %s2899_s5  ;;  %v1210_v61 = vld [vmem:[%s3424_s7 + $0x8] sm:$0xff] }
 0xcd4   :  { %v717_v63 = vpop.permute.xlu0 %716 }
 0xcd5   :  { %v719_v23 = vadd.f32 %v717_v63, %v709_v62  ;;  %v3188_v62 = vpack.c.bf16 %v1210_v61, %v1209_v60  ;;  %v1211_v63 = vld [vmem:[%s3424_s7 + $0x10] sm:$0xff] }
 0xcd7   :  { %2805 = vtanh.f32 %v719_v23 }
 0xce1   :  { %v2806_v0 = vpop.eup %2805 }
 0xce2   :  { %722 = vrot.lane.b32.xlu1 %v2806_v0, %s2898_s21 }
 0xd54   :  { %v723_v1 = vpop.permute.xlu1 %722 }
 0xd55   :  { %v725_v2 = vmul.f32 %v2804_v59, %v723_v1 }
 0xd57   :  { %727 = vrot.lane.b32.xlu0 %v725_v2, %s2899_s5 }
 0xdc9   :  { %v728_v3 = vpop.permute.xlu0 %727 }
 0xdca   :  { %731 = vst.msk [vmem:[#allocation3 + $0x20] sm:$0xff] %vm60_vm0, %v728_v3  ;;  %2485 = vmatmul.mubr.msk.f32.vlgmr.msra.gmra.mrb[10].mxu1 %vm60_vm0, %v728_v3  ;;  %v2257_v3 = vld [vmem:[%s3422_s2 + $0x8] sm:$0xff] }
 0xdcb   :  { %2689 = vmatpush3.bf16.msra.mxu1 %v3000_v11  ;;  %2506 = vmatprep.mubr.msk.f32.mxu1 %vm2896_vm1, %v2897_v19 }
 0xdcc   :  { %2690 = vmatprep.subr.bf16.mxu1 %v2895_v13 }
 0xdcf   :  { %2692 = vmatpush3.bf16.msra.mxu1 %v3023_v18 }
 0xdd0   :  { %2701 = vmatprep.subr.bf16.mxu1 %v2895_v13 }
 0xdd1   :  { %v1057_v38 = vld [vmem:[#allocation3 + $0x20] sm:$0xff] }
 0xe9d   :  { %v802_v5 = vpop.f32.mrb[10].mxu1 }
 0xe9e   :  { %v806_v6 = vadd.f32 %v802_v5, %v177_v4  ;;  %v2486_v7 = vpop.f32.mrb[11].mxu1  ;;  %v2256_v5 = vld [vmem:[%s3420_s1 + $0x8] sm:$0xff]  ;;  %s2900_s1 = smov 96  }
 0xe9f   :  { %v187_v7 = vadd.f32 %v3054_v26, %v3052_v25 }
 0xea0   :  { %2807 = vtanh.f32 %v806_v6  ;;  %v2242_v11 = vmul.f32 -1.442695, %v806_v6 }
 0xea2   :  { %2809 = vpow2.f32 %v2242_v11 }
 0xeaa   :  { %v2808_v8 = vpop.eup %2807 }
 0xeab   :  { %816 = vrot.lane.b32.xlu1 %v2808_v8, %s2898_s21 }
 0xeac   :  { %v2810_v9 = vpop.eup %2809 }
 0xead   :  { %v810_v10 = vadd.f32 1.0, %v2810_v9 }
 0xeaf   :  { %2811 = vrcp.f32 %v810_v10  ;;  %v3231_v10 = vld [vmem:[%s3425_s8] ss:$0 sm:$0xff] }
 0xeb9   :  { %v2812_v12 = vpop.eup %2811 }
 0xeba   :  { %v814_v15 = vmul.f32 %v2812_v12, %v719_v23  ;;  %v1212_v23 = vld [vmem:[%s3424_s7 + $0x18] sm:$0xff] }
 0xebb   :  { %v3198_v0 = vpack.c.bf16 %v1212_v23, %v1211_v63 }
 0xf1d   :  { %v817_v14 = vpop.permute.xlu1 %816 }
 0xf1e   :  { %v819_v18 = vmul.f32 %v2812_v12, %v817_v14 }
 0xf20   :  { %821 = vrot.lane.b32.xlu0 %v819_v18, %s2899_s5 }
 0xf92   :  { %v822_v16 = vpop.permute.xlu0 %821 }
 0xf93   :  { %v824_v21 = vadd.f32 %v822_v16, %v814_v15 }
 0xf95   :  { %2813 = vtanh.f32 %v824_v21 }
 0xf9f   :  { %v2814_v24 = vpop.eup %2813 }
 0xfa0   :  { %827 = vrot.lane.b32.xlu1 %v2814_v24, %s2898_s21 }
0x1012   :  { %v828_v28 = vpop.permute.xlu1 %827 }
0x1013   :  { %v830_v29 = vmul.f32 %v2812_v12, %v828_v28 }
0x1015   :  { %832 = vrot.lane.b32.xlu0 %v830_v29, %s2899_s5 }
0x1087   :  { %v833_v33 = vpop.permute.xlu0 %832 }
0x1088   :  { %836 = vst.msk [vmem:[#allocation3 + $0x28] sm:$0xff] %vm60_vm0, %v833_v33  ;;  %2496 = vmatmul.mubr.msk.f32.vlgmr.msra.gmra.mrb[8].mxu0 %vm60_vm0, %v833_v33 }
0x1089   :  { %2696 = vmatpush3.bf16.msra.mxu0 %v2693_v22  ;;  %2517 = vmatprep.mubr.msk.f32.mxu0 %vm60_vm0, %v1053_v34 }
0x108a   :  { %2698 = vmatprep.subr.bf16.mxu0 %v2697_v32 }
0x108d   :  { %2700 = vmatpush3.bf16.msra.mxu0 %v2697_v32 }
0x108e   :  { %2713 = vmatprep.subr.bf16.mxu0 %v2895_v13 }
0x108f   :  { %v1058_v39 = vld [vmem:[#allocation3 + $0x28] sm:$0xff] }
0x1090   :  { %2518 = vmatmul.mubr.msk.f32.vlgmr.msra.gmra.mrb[10].mxu0 %vm60_vm0, %v1054_v35 }
0x1091   :  { %2520 = vmatprep.mubr.msk.f32.mxu0 %vm60_vm0, %v1055_v36  ;;  %2715 = vmatpush3.bf16.msra.mxu0 %v3188_v62 }
0x1092   :  { %2716 = vmatprep.subr.bf16.mxu0 %v2895_v13 }
0x1094   :  { %2521 = vmatmul.mubr.msk.f32.gmra.mrb[12].mxu0 %vm60_vm0, %v1056_v37 }
0x1095   :  { %2523 = vmatprep.mubr.msk.f32.mxu0 %vm60_vm0, %v1057_v38  ;;  %2718 = vmatpush3.bf16.msra.mxu0 %v3198_v0 }
0x1096   :  { %2725 = vmatprep.subr.bf16.mxu0 %v2895_v13 }
0x1098   :  { %2524 = vmatmul.mubr.msk.f32.gmra.mrb[14].mxu0 %vm60_vm0, %v1058_v39 }
0x115b   :  { %v907_v41 = vpop.f32.mrb[8].mxu0 }
0x115c   :  { %v911_v42 = vadd.f32 %v907_v41, %v182_v40  ;;  %v2497_v43 = vpop.f32.mrb[9].mxu0 }
0x115e   :  { %2815 = vtanh.f32 %v911_v42  ;;  %v2244_v51 = vmul.f32 -1.442695, %v911_v42 }
0x1160   :  { %2817 = vpow2.f32 %v2244_v51 }
0x1163   :  { %v3166_v44 = vpop.f32.mrb[10].mxu0 }
0x1164   :  { %v1162_v45 = vpop.f32.mrb[11].mxu0 }
0x1165   :  { %v1163_v12 = vadd.f32 %v3231_v10, %v1162_v45 }
0x1167   :  { %v3168_v46 = vpop.f32.mrb[12].mxu0 }
0x1168   :  { %v2816_v47 = vpop.eup %2815  ;;  %v3170_v48 = vpop.f32.mrb[13].mxu0 }
0x1169   :  { %921 = vrot.lane.b32.xlu1 %v2816_v47, %s2898_s21 }
0x116a   :  { %v2818_v27 = vpop.eup %2817 }
0x116b   :  { %v3173_v49 = vpop.f32.mrb[14].mxu0  ;;  %v915_v52 = vadd.f32 1.0, %v2818_v27 }
0x116c   :  { %v3175_v50 = vpop.f32.mrb[15].mxu0 }
0x116d   :  { %2819 = vrcp.f32 %v915_v52  ;;  %v1168_v52 = vadd.f32 %v3166_v44, %v3231_v10 }
0x1177   :  { %v2820_v53 = vpop.eup %2819 }
0x1178   :  { %v919_v56 = vmul.f32 %v2820_v53, %v824_v21 }
0x11db   :  { %v922_v54 = vpop.permute.xlu1 %921 }
0x11dc   :  { %v924_v55 = vmul.f32 %v2820_v53, %v922_v54 }
0x11de   :  { %926 = vrot.lane.b32.xlu0 %v924_v55, %s2899_s5 }
0x1250   :  { %v927_v57 = vpop.permute.xlu0 %926 }
0x1251   :  { %v3178_v58 = vadd.f32 %v927_v57, %v919_v56 }
0x1253   :  { %2821 = vtanh.f32 %v3178_v58 }
0x125d   :  { %v2822_v59 = vpop.eup %2821 }
0x125e   :  { %932 = vrot.lane.b32.xlu1 %v2822_v59, %s2898_s21 }
0x12d0   :  { %v933_v1 = vpop.permute.xlu1 %932 }
0x12d1   :  { %v935_v2 = vmul.f32 %v2820_v53, %v933_v1 }
0x12d3   :  { %937 = vrot.lane.b32.xlu0 %v935_v2, %s2899_s5 }
0x12d7   :  { %1300 = vrot.lane.b32.xlu0 %v2257_v3, %s2899_s5 }
0x1345   :  { %v938_v4 = vpop.permute.xlu0 %937 }
0x1346   :  { %941 = vst.msk [vmem:[#allocation3 + $0x30] sm:$0xff] %vm60_vm0, %v938_v4  ;;  %2507 = vmatmul.mubr.msk.f32.vlgmr.msra.gmra.mrb[12].mxu1 %vm60_vm0, %v938_v4 }
0x1347   :  { %2703 = vmatpush3.bf16.msra.mxu1 %v3188_v62  ;;  %2537 = vmatprep.mubr.msk.f32.mxu1 %vm2896_vm1, %v2897_v19 }
0x1348   :  { %2704 = vmatprep.subr.bf16.mxu1 %v2895_v13 }
0x1349   :  { %v1301_v24 = vpop.permute.xlu0 %1300 }
0x134b   :  { %2706 = vmatpush3.bf16.msra.mxu1 %v3198_v0 }
0x134c   :  { %2707 = vmatprep.subr.bf16.mxu1 %v2895_v13 }
0x134d   :  { %v1059_v6 = vld [vmem:[#allocation3 + $0x30] sm:$0xff] }
0x134e   :  { %2538 = vmatmul.mubr.msk.f32.vlgmr.msra.gmra.mrb[14].mxu1 %vm60_vm0, %v2256_v5  ;;  %2526 = vmatprep.mubr.msk.f32.mxu0 %vm60_vm0, %v1059_v6 }
0x134f   :  { %2709 = vmatpush3.bf16.msra.mxu1 %v3188_v62  ;;  %2548 = vmatprep.mubr.msk.f32.mxu1 %vm2896_vm1, %v2897_v19 }
0x1350   :  { %2710 = vmatprep.subr.bf16.mxu1 %v2895_v13 }
0x1353   :  { %2712 = vmatpush3.bf16.msra.mxu1 %v3198_v0 }
0x1354   :  { %2719 = vmatprep.subr.bf16.mxu1 %v2895_v13 }
0x1419   :  { %v1012_v8 = vpop.f32.mrb[12].mxu1 }
0x141a   :  { %v1016_v11 = vadd.f32 %v1012_v8, %v187_v7  ;;  %v2508_v9 = vpop.f32.mrb[13].mxu1 }
0x141b   :  { %v1173_v9 = vadd.f32 %v3231_v10, %v3170_v48 }
0x141c   :  { %v2246_v33 = vmul.f32 -1.442695, %v1016_v11 }
0x1421   :  { %v1287_v14 = vpop.f32.mrb[14].mxu1 }
0x1422   :  { %v1291_v18 = vadd.f32 %v1287_v14, %v1163_v12  ;;  %v2539_v15 = vpop.f32.mrb[15].mxu1 }
0x1424   :  { %2823 = vtanh.f32 %v1291_v18  ;;  %v2259_v21 = vmul.f32 -1.442695, %v1291_v18 }
0x1426   :  { %2825 = vpow2.f32 %v2259_v21 }
0x142e   :  { %v2824_v16 = vpop.eup %2823 }
0x142f   :  { %1305 = vrot.lane.b32.xlu1 %v2824_v16, %s2898_s21 }
0x1430   :  { %v2826_v25 = vpop.eup %2825 }
0x1431   :  { %v1295_v26 = vadd.f32 1.0, %v2826_v25 }
0x1433   :  { %2827 = vrcp.f32 %v1295_v26 }
0x143d   :  { %v2828_v17 = vpop.eup %2827 }
0x143e   :  { %v1303_v28 = vmul.f32 %v2828_v17, %v1301_v24 }
0x14a1   :  { %v1306_v20 = vpop.permute.xlu1 %1305 }
0x14a2   :  { %v1308_v22 = vmul.f32 %v2828_v17, %v1306_v20 }
0x14a4   :  { %1310 = vrot.lane.b32.xlu1 %v1308_v22, %s2899_s5 }
0x1516   :  { %v1311_v29 = vpop.permute.xlu1 %1310 }
0x1517   :  { %v1313_v30 = vadd.f32 %v1311_v29, %v1303_v28 }
0x1519   :  { %2829 = vtanh.f32 %v1313_v30 }
0x151a   :  { %2831 = vtanh.f32 %v1016_v11 }
0x151b   :  { %2833 = vpow2.f32 %v2246_v33 }
0x1523   :  { %v2830_v31 = vpop.eup %2829 }
0x1524   :  { %1316 = vrot.lane.b32.xlu0 %v2830_v31, %s2898_s21  ;;  %v2832_v32 = vpop.eup %2831 }
0x1525   :  { %v2834_v34 = vpop.eup %2833 }
0x1526   :  { %v1020_v35 = vadd.f32 1.0, %v2834_v34 }
0x1528   :  { %1026 = vrot.lane.b32.xlu0 %v2832_v32, %s2898_s21  ;;  %2835 = vrcp.f32 %v1020_v35  ;;  %v1178_v32 = vadd.f32 %v3168_v46, %v3231_v10 }
0x1532   :  { %v2836_v38 = vpop.eup %2835 }
0x1533   :  { %v1024_v42 = vmul.f32 %v2836_v38, %v3178_v58 }
0x1596   :  { %v1317_v36 = vpop.permute.xlu0 %1316 }
0x1597   :  { %v1319_v37 = vmul.f32 %v2828_v17, %v1317_v36 }
0x1599   :  { %1321 = vrot.lane.b32.xlu1 %v1319_v37, %s2899_s5 }
0x159a   :  { %v1027_v39 = vpop.permute.xlu0 %1026 }
0x159b   :  { %v1029_v40 = vmul.f32 %v2836_v38, %v1027_v39 }
0x159d   :  { %1031 = vrot.lane.b32.xlu0 %v1029_v40, %s2899_s5 }
0x160b   :  { %v1322_v41 = vpop.permute.xlu1 %1321 }
0x160c   :  { %1324 = vst.msk [vmem:[#allocation3] sm:$0xff] %vm60_vm0, %v1322_v41  ;;  %2549 = vmatmul.mubr.msk.f32.vlgmr.msra.gmra.mrb[16].mxu1 %vm60_vm0, %v1322_v41 }
0x160d   :  { %2721 = vmatpush3.bf16.msra.mxu1 %v3188_v62  ;;  %2570 = vmatprep.mubr.msk.f32.mxu1 %vm2896_vm1, %v2897_v19 }
0x160e   :  { %2722 = vmatprep.subr.bf16.mxu1 %v2895_v13 }
0x160f   :  { %v1032_v43 = vpop.permute.xlu0 %1031 }
0x1610   :  { %v3247_v45 = vadd.f32 %v1032_v43, %v1024_v42 }
0x1611   :  { %2724 = vmatpush3.bf16.msra.mxu1 %v3198_v0 }
0x1612   :  { %2837 = vtanh.f32 %v3247_v45  ;;  %2731 = vmatprep.subr.bf16.mxu1 %v2895_v13 }
0x161c   :  { %v2838_v47 = vpop.eup %2837 }
0x161d   :  { %1037 = vrot.lane.b32.xlu0 %v2838_v47, %s2898_s21 }
0x168f   :  { %v1038_v51 = vpop.permute.xlu0 %1037 }
0x1690   :  { %v1040_v27 = vmul.f32 %v2836_v38, %v1038_v51 }
0x1692   :  { %1042 = vrot.lane.b32.xlu0 %v1040_v27, %s2899_s5 }
0x16df   :  { %v1394_v53 = vpop.f32.mrb[16].mxu1 }
0x16e0   :  { %v1398_v54 = vadd.f32 %v1394_v53, %v1168_v52  ;;  %v2550_v55 = vpop.f32.mrb[17].mxu1 }
0x16e2   :  { %2839 = vtanh.f32 %v1398_v54  ;;  %v2261_v44 = vmul.f32 -1.442695, %v1398_v54  ;;  %v1183_v54 = vadd.f32 %v3231_v10, %v3175_v50 }
0x16e4   :  { %2841 = vpow2.f32 %v2261_v44 }
0x16ec   :  { %v2840_v56 = vpop.eup %2839 }
0x16ed   :  { %1408 = vrot.lane.b32.xlu1 %v2840_v56, %s2898_s21 }
0x16ee   :  { %v2842_v59 = vpop.eup %2841 }
0x16ef   :  { %v1402_v60 = vadd.f32 1.0, %v2842_v59 }
0x16f1   :  { %2843 = vrcp.f32 %v1402_v60 }
0x16fb   :  { %v2844_v61 = vpop.eup %2843 }
0x16fc   :  { %v1406_v1 = vmul.f32 %v2844_v61, %v1313_v30 }
0x1704   :  { %v1043_v57 = vpop.permute.xlu0 %1042 }
0x1705   :  { %1046 = vst.msk [vmem:[#allocation3 + $0x38] sm:$0xff] %vm60_vm0, %v1043_v57  ;;  %1047 = vst.msk [vmem:[%s3426_s12] sm:$0xff] %vm60_vm0, %v1043_v57 }
0x170c   :  { %v1060_v58 = vld [vmem:[#allocation3 + $0x38] sm:$0xff] }
0x170d   :  { %2527 = vmatmul.mubr.msk.f32.gmra.mrb[16].mxu0 %vm60_vm0, %v1060_v58 }
0x170e   :  { %2559 = vmatprep.mubr.msk.f32.mxu0 %vm2896_vm1, %v2897_v19 }
0x175f   :  { %v1409_v63 = vpop.permute.xlu1 %1408 }
0x1760   :  { %v1411_v23 = vmul.f32 %v2844_v61, %v1409_v63 }
0x1762   :  { %1413 = vrot.lane.b32.xlu1 %v1411_v23, %s2899_s5 }
0x17d4   :  { %v1414_v2 = vpop.permute.xlu1 %1413 }
0x17d5   :  { %v1416_v3 = vadd.f32 %v1414_v2, %v1406_v1 }
0x17d7   :  { %2845 = vtanh.f32 %v1416_v3 }
0x17e0   :  { %v3266_v4 = vpop.f32.mrb[16].mxu0 }
0x17e1   :  { %v2846_v5 = vpop.eup %2845  ;;  %v3268_v6 = vpop.f32.mrb[17].mxu0 }
0x17e2   :  { %1419 = vrot.lane.b32.xlu1 %v2846_v5, %s2898_s21 }
0x1854   :  { %v1420_v7 = vpop.permute.xlu1 %1419 }
0x1855   :  { %v1422_v8 = vmul.f32 %v2844_v61, %v1420_v7 }
0x1857   :  { %1424 = vrot.lane.b32.xlu1 %v1422_v8, %s2899_s5 }
0x18c9   :  { %v1425_v11 = vpop.permute.xlu1 %1424 }
0x18ca   :  { %1427 = vst.msk [vmem:[#allocation3 + $0x8] sm:$0xff] %vm60_vm0, %v1425_v11  ;;  %2560 = vmatmul.mubr.msk.f32.vlgmr.msra.gmra.mrb[18].mxu0 %vm60_vm0, %v1425_v11  ;;  %v1188_v11 = vadd.f32 %v3173_v49, %v3231_v10 }
0x18cb   :  { %2727 = vmatpush3.bf16.msra.mxu0 %v3188_v62  ;;  %2581 = vmatprep.mubr.msk.f32.mxu0 %vm2896_vm1, %v2897_v19 }
0x18cc   :  { %2728 = vmatprep.subr.bf16.mxu0 %v2895_v13 }
0x18cf   :  { %2730 = vmatpush3.bf16.msra.mxu0 %v3198_v0 }
0x18d0   :  { %2737 = vmatprep.subr.bf16.mxu0 %v2895_v13 }
0x199d   :  { %v1497_v12 = vpop.f32.mrb[18].mxu0 }
0x199e   :  { %v1501_v14 = vadd.f32 %v1497_v12, %v1173_v9  ;;  %v2561_v18 = vpop.f32.mrb[19].mxu0 }
0x19a0   :  { %2847 = vtanh.f32 %v1501_v14  ;;  %v2263_v16 = vmul.f32 -1.442695, %v1501_v14 }
0x19a2   :  { %2849 = vpow2.f32 %v2263_v16 }
0x19aa   :  { %v2848_v15 = vpop.eup %2847 }
0x19ab   :  { %1511 = vrot.lane.b32.xlu0 %v2848_v15, %s2898_s21 }
0x19ac   :  { %v2850_v21 = vpop.eup %2849 }
0x19ad   :  { %v1505_v25 = vadd.f32 1.0, %v2850_v21 }
0x19af   :  { %2851 = vrcp.f32 %v1505_v25 }
0x19b9   :  { %v2852_v26 = vpop.eup %2851 }
0x19ba   :  { %v1509_v22 = vmul.f32 %v2852_v26, %v1416_v3 }
0x1a1d   :  { %v1512_v17 = vpop.permute.xlu0 %1511 }
0x1a1e   :  { %v1514_v20 = vmul.f32 %v2852_v26, %v1512_v17  ;;  %v2063_v17 = vld [vmem:[%s3427_s9 + $0x8] sm:$0xff] }
0x1a20   :  { %1516 = vrot.lane.b32.xlu1 %v1514_v20, %s2899_s5 }
0x1a92   :  { %v1517_v24 = vpop.permute.xlu1 %1516 }
0x1a93   :  { %v1519_v48 = vadd.f32 %v1517_v24, %v1509_v22 }
0x1a95   :  { %2853 = vtanh.f32 %v1519_v48 }
0x1a9f   :  { %v2854_v28 = vpop.eup %2853 }
0x1aa0   :  { %1522 = vrot.lane.b32.xlu0 %v2854_v28, %s2898_s21  ;;  %v2064_v28 = vld [vmem:[%s3427_s9 + $0x10] sm:$0xff] }
0x1b12   :  { %v1523_v29 = vpop.permute.xlu0 %1522 }
0x1b13   :  { %v1525_v30 = vmul.f32 %v2852_v26, %v1523_v29  ;;  %v2062_v26 = vld [vmem:[%s3427_s9] sm:$0xff]  ;;  %v2065_v29 = vld [vmem:[%s3427_s9 + $0x18] sm:$0xff] }
0x1b14   :  { %v2749_v20 = vpack.c.bf16 %v2063_v17, %v2062_v26 }
0x1b15   :  { %1527 = vrot.lane.b32.xlu1 %v1525_v30, %s2899_s5  ;;  %v2753_v30 = vpack.c.bf16 %v2065_v29, %v2064_v28 }
0x1b87   :  { %v1528_v31 = vpop.permute.xlu1 %1527 }
0x1b88   :  { %1530 = vst.msk [vmem:[#allocation3 + $0x10] sm:$0xff] %vm60_vm0, %v1528_v31  ;;  %2571 = vmatmul.mubr.msk.f32.vlgmr.msra.gmra.mrb[18].mxu1 %vm60_vm0, %v1528_v31 }
0x1b89   :  { %2733 = vmatpush3.bf16.msra.mxu1 %v3188_v62  ;;  %2592 = vmatprep.mubr.msk.f32.mxu1 %vm2896_vm1, %v2897_v19 }
0x1b8a   :  { %2734 = vmatprep.subr.bf16.mxu1 %v2895_v13 }
0x1b8d   :  { %2736 = vmatpush3.bf16.msra.mxu1 %v3198_v0 }
0x1b8e   :  { %2743 = vmatprep.subr.bf16.mxu1 %v2895_v13 }
0x1c5b   :  { %v1600_v33 = vpop.f32.mrb[18].mxu1 }
0x1c5c   :  { %v1604_v34 = vadd.f32 %v1600_v33, %v1178_v32  ;;  %v2572_v35 = vpop.f32.mrb[19].mxu1  ;;  %v2054_v32 = vld [vmem:[#allocation3] sm:$0xff]  ;;  %v2055_v33 = vld [vmem:[#allocation3 + $0x8] sm:$0xff] }
0x1c5e   :  { %2855 = vtanh.f32 %v1604_v34  ;;  %v2265_v37 = vmul.f32 -1.442695, %v1604_v34  ;;  %v2056_v34 = vld [vmem:[#allocation3 + $0x10] sm:$0xff] }
0x1c60   :  { %2857 = vpow2.f32 %v2265_v37 }
0x1c68   :  { %v2856_v36 = vpop.eup %2855 }
0x1c69   :  { %1614 = vrot.lane.b32.xlu0 %v2856_v36, %s2898_s21 }
0x1c6a   :  { %v2858_v38 = vpop.eup %2857 }
0x1c6b   :  { %v1608_v39 = vadd.f32 1.0, %v2858_v38  ;;  %v1193_v38 = vadd.f32 %v3231_v10, %v3268_v6 }
0x1c6d   :  { %2859 = vrcp.f32 %v1608_v39 }
0x1c77   :  { %v2860_v40 = vpop.eup %2859 }
0x1c78   :  { %v1612_v43 = vmul.f32 %v2860_v40, %v1519_v48 }
0x1cdb   :  { %v1615_v41 = vpop.permute.xlu0 %1614 }
0x1cdc   :  { %v1617_v42 = vmul.f32 %v2860_v40, %v1615_v41 }
0x1cde   :  { %1619 = vrot.lane.b32.xlu1 %v1617_v42, %s2899_s5  ;;  %v3354_v42 = vld [vmem:[%s3428_s10] ss:$0 sm:$0xff] }
0x1d50   :  { %v1620_v47 = vpop.permute.xlu1 %1619 }
0x1d51   :  { %v1622_v46 = vadd.f32 %v1620_v47, %v1612_v43 }
0x1d53   :  { %2861 = vtanh.f32 %v1622_v46 }
0x1d5d   :  { %v2862_v51 = vpop.eup %2861 }
0x1d5e   :  { %1625 = vrot.lane.b32.xlu0 %v2862_v51, %s2898_s21 }
0x1dd0   :  { %v1626_v27 = vpop.permute.xlu0 %1625 }
0x1dd1   :  { %v1628_v52 = vmul.f32 %v2860_v40, %v1626_v27 }
0x1dd3   :  { %1630 = vrot.lane.b32.xlu1 %v1628_v52, %s2899_s5 }
0x1e45   :  { %v1631_v53 = vpop.permute.xlu1 %1630 }
0x1e46   :  { %1633 = vst.msk [vmem:[#allocation3 + $0x18] sm:$0xff] %vm60_vm0, %v1631_v53  ;;  %2582 = vmatmul.mubr.msk.f32.vlgmr.msra.gmra.mrb[20].mxu0 %vm60_vm0, %v1631_v53 }
0x1e47   :  { %2739 = vmatpush3.bf16.msra.mxu0 %v3188_v62  ;;  %2603 = vmatprep.mubr.msk.f32.mxu0 %vm2896_vm1, %v2897_v19 }
0x1e48   :  { %2740 = vmatprep.subr.bf16.mxu0 %v2895_v13 }
0x1e4b   :  { %2742 = vmatpush3.bf16.msra.mxu0 %v3198_v0 }
0x1e4c   :  { %2750 = vmatprep.subr.bf16.mxu0 %v2749_v20 }
0x1e4d   :  { %v2057_v35 = vld [vmem:[#allocation3 + $0x18] sm:$0xff] }
0x1f19   :  { %v1703_v55 = vpop.f32.mrb[20].mxu0 }
0x1f1a   :  { %v1707_v56 = vadd.f32 %v1703_v55, %v1183_v54  ;;  %v2583_v57 = vpop.f32.mrb[21].mxu0 }
0x1f1c   :  { %2863 = vtanh.f32 %v1707_v56  ;;  %v2267_v44 = vmul.f32 -1.442695, %v1707_v56 }
0x1f1e   :  { %2865 = vpow2.f32 %v2267_v44 }
0x1f26   :  { %v2864_v58 = vpop.eup %2863 }
0x1f27   :  { %1717 = vrot.lane.b32.xlu0 %v2864_v58, %s2898_s21 }
0x1f28   :  { %v2866_v59 = vpop.eup %2865 }
0x1f29   :  { %v1711_v60 = vadd.f32 1.0, %v2866_v59 }
0x1f2b   :  { %2867 = vrcp.f32 %v1711_v60 }
0x1f35   :  { %v2868_v61 = vpop.eup %2867 }
0x1f36   :  { %v1715_v1 = vmul.f32 %v2868_v61, %v1622_v46 }
0x1f99   :  { %v1718_v63 = vpop.permute.xlu0 %1717 }
0x1f9a   :  { %v1720_v23 = vmul.f32 %v2868_v61, %v1718_v63 }
0x1f9c   :  { %1722 = vrot.lane.b32.xlu1 %v1720_v23, %s2899_s5 }
0x200e   :  { %v1723_v2 = vpop.permute.xlu1 %1722 }
0x200f   :  { %v1725_v50 = vadd.f32 %v1723_v2, %v1715_v1 }
0x2011   :  { %2869 = vtanh.f32 %v1725_v50 }
0x201b   :  { %v2870_v3 = vpop.eup %2869 }
0x201c   :  { %1728 = vrot.lane.b32.xlu0 %v2870_v3, %s2898_s21 }
0x208e   :  { %v1729_v5 = vpop.permute.xlu0 %1728 }
0x208f   :  { %v1731_v7 = vmul.f32 %v2868_v61, %v1729_v5 }
0x2091   :  { %1733 = vrot.lane.b32.xlu1 %v1731_v7, %s2899_s5 }
0x2103   :  { %v1734_v8 = vpop.permute.xlu1 %1733 }
0x2104   :  { %1736 = vst.msk [vmem:[#allocation3 + $0x20] sm:$0xff] %vm60_vm0, %v1734_v8  ;;  %2593 = vmatmul.mubr.msk.f32.vlgmr.msra.gmra.mrb[20].mxu1 %vm60_vm0, %v1734_v8 }
0x2105   :  { %2745 = vmatpush3.bf16.msra.mxu1 %v3188_v62  ;;  %2614 = vmatprep.mubr.msk.f32.mxu1 %vm2896_vm1, %v2897_v19 }
0x2106   :  { %2746 = vmatprep.subr.bf16.mxu1 %v2895_v13 }
0x2109   :  { %2748 = vmatpush3.bf16.msra.mxu1 %v3198_v0 }
0x210b   :  { %v2058_v36 = vld [vmem:[#allocation3 + $0x20] sm:$0xff] }
0x21d7   :  { %v1806_v9 = vpop.f32.mrb[20].mxu1 }
0x21d8   :  { %v1810_v12 = vadd.f32 %v1806_v9, %v1188_v11  ;;  %v2594_v14 = vpop.f32.mrb[21].mxu1  ;;  %v1198_v9 = vadd.f32 %v3266_v4, %v3231_v10 }
0x21da   :  { %2871 = vtanh.f32 %v1810_v12  ;;  %v2269_v15 = vmul.f32 -1.442695, %v1810_v12 }
0x21dc   :  { %2873 = vpow2.f32 %v2269_v15 }
0x21e4   :  { %v2872_v18 = vpop.eup %2871 }
0x21e5   :  { %1820 = vrot.lane.b32.xlu0 %v2872_v18, %s2898_s21 }
0x21e6   :  { %v2874_v62 = vpop.eup %2873 }
0x21e7   :  { %v1814_v16 = vadd.f32 1.0, %v2874_v62 }
0x21e9   :  { %2875 = vrcp.f32 %v1814_v16 }
0x21f3   :  { %v2876_v19 = vpop.eup %2875 }
0x21f4   :  { %v1818_v0 = vmul.f32 %v2876_v19, %v1725_v50 }
0x2257   :  { %v1821_v21 = vpop.permute.xlu0 %1820 }
0x2258   :  { %v1823_v13 = vmul.f32 %v2876_v19, %v1821_v21 }
0x225a   :  { %1825 = vrot.lane.b32.xlu1 %v1823_v13, %s2899_s5 }
0x22cc   :  { %v1826_v25 = vpop.permute.xlu1 %1825 }
0x22cd   :  { %v3324_v49 = vadd.f32 %v1826_v25, %v1818_v0 }
0x22cf   :  { %2877 = vtanh.f32 %v3324_v49 }
0x22d9   :  { %v2878_v22 = vpop.eup %2877 }
0x22da   :  { %1831 = vrot.lane.b32.xlu0 %v2878_v22, %s2898_s21 }
0x234c   :  { %v1832_v24 = vpop.permute.xlu0 %1831 }
0x234d   :  { %v1834_v48 = vmul.f32 %v2876_v19, %v1832_v24 }
0x234f   :  { %1836 = vrot.lane.b32.xlu1 %v1834_v48, %s2899_s5 }
0x23c1   :  { %v1837_v31 = vpop.permute.xlu1 %1836 }
0x23c2   :  { %1839 = vst.msk [vmem:[#allocation3 + $0x28] sm:$0xff] %vm60_vm0, %v1837_v31  ;;  %2604 = vmatmul.mubr.msk.f32.vlgmr.msra.gmra.mrb[22].mxu0 %vm60_vm0, %v1837_v31 }
0x23c3   :  { %2752 = vmatpush3.bf16.msra.mxu0 %v2749_v20  ;;  %2625 = vmatprep.mubr.msk.f32.mxu0 %vm60_vm0, %v2054_v32 }
0x23c4   :  { %2754 = vmatprep.subr.bf16.mxu0 %v2753_v30 }
0x23c7   :  { %2756 = vmatpush3.bf16.msra.mxu0 %v2753_v30 }
0x23c9   :  { %v2059_v37 = vld [vmem:[#allocation3 + $0x28] sm:$0xff] }
0x23ca   :  { %2626 = vmatmul.mubr.msk.f32.vlgmr.msra.gmra.mrb[24].mxu0 %vm60_vm0, %v2055_v33 }
0x23cb   :  { %2628 = vmatprep.mubr.msk.f32.mxu0 %vm60_vm0, %v2056_v34 }
0x23ce   :  { %2629 = vmatmul.mubr.msk.f32.gmra.mrb[26].mxu0 %vm60_vm0, %v2057_v35 }
0x23cf   :  { %2631 = vmatprep.mubr.msk.f32.mxu0 %vm60_vm0, %v2058_v36 }
0x23d2   :  { %2632 = vmatmul.mubr.msk.f32.gmra.mrb[28].mxu0 %vm60_vm0, %v2059_v37 }
0x2495   :  { %v1909_v39 = vpop.f32.mrb[22].mxu0 }
0x2496   :  { %v1913_v40 = vadd.f32 %v1909_v39, %v1193_v38  ;;  %v2605_v41 = vpop.f32.mrb[23].mxu0 }
0x2498   :  { %2879 = vtanh.f32 %v1913_v40  ;;  %v2271_v44 = vmul.f32 -1.442695, %v1913_v40 }
0x249a   :  { %2881 = vpow2.f32 %v2271_v44 }
0x249d   :  { %v2627_v43 = vpop.f32.mrb[24].mxu0 }
0x249e   :  { %v2169_v47 = vadd.f32 %v2627_v43, %v3354_v42  ;;  %v2163_v46 = vpop.f32.mrb[25].mxu0 }
0x249f   :  { %v2164_v51 = vadd.f32 %v3354_v42, %v2163_v46 }
0x24a0   :  { %2203 = vst [vmem:[%s3429_s11 + $0x8] sm:$0xff] %v2169_v47 }
0x24a1   :  { %2202 = vst [vmem:[%s3429_s11] sm:$0xff] %v2164_v51  ;;  %v2630_v6 = vpop.f32.mrb[26].mxu0 }
0x24a2   :  { %v2880_v27 = vpop.eup %2879  ;;  %v2179_v52 = vadd.f32 %v2630_v6, %v3354_v42  ;;  %v2173_v53 = vpop.f32.mrb[27].mxu0 }
0x24a3   :  { %v2174_v54 = vadd.f32 %v3354_v42, %v2173_v53  ;;  %1923 = vrot.lane.b32.xlu0 %v2880_v27, %s2898_s21 }
0x24a4   :  { %2205 = vst [vmem:[%s3429_s11 + $0x18] sm:$0xff] %v2179_v52  ;;  %v2882_v59 = vpop.eup %2881 }
0x24a5   :  { %2204 = vst [vmem:[%s3429_s11 + $0x10] sm:$0xff] %v2174_v54  ;;  %v2633_v55 = vpop.f32.mrb[28].mxu0  ;;  %v1917_v60 = vadd.f32 1.0, %v2882_v59 }
0x24a6   :  { %v2189_v56 = vadd.f32 %v2633_v55, %v3354_v42  ;;  %v2183_v57 = vpop.f32.mrb[29].mxu0 }
0x24a7   :  { %v2184_v58 = vadd.f32 %v3354_v42, %v2183_v57  ;;  %2883 = vrcp.f32 %v1917_v60 }
0x24a8   :  { %2207 = vst [vmem:[%s3429_s11 + $0x28] sm:$0xff] %v2189_v56 }
0x24a9   :  { %2206 = vst [vmem:[%s3429_s11 + $0x20] sm:$0xff] %v2184_v58 }
0x24b1   :  { %v2884_v61 = vpop.eup %2883 }
0x24b2   :  { %v1921_v1 = vmul.f32 %v2884_v61, %v3324_v49 }
0x2515   :  { %v1924_v63 = vpop.permute.xlu0 %1923 }
0x2516   :  { %v1926_v23 = vmul.f32 %v2884_v61, %v1924_v63 }
0x2518   :  { %1928 = vrot.lane.b32.xlu1 %v1926_v23, %s2899_s5 }
0x258a   :  { %v1929_v2 = vpop.permute.xlu1 %1928 }
0x258b   :  { %v1931_v50 = vadd.f32 %v1929_v2, %v1921_v1 }
0x258d   :  { %2885 = vtanh.f32 %v1931_v50 }
0x2597   :  { %v2886_v3 = vpop.eup %2885 }
0x2598   :  { %1934 = vrot.lane.b32.xlu0 %v2886_v3, %s2898_s21 }
0x260a   :  { %v1935_v5 = vpop.permute.xlu0 %1934 }
0x260b   :  { %v1937_v7 = vmul.f32 %v2884_v61, %v1935_v5 }
0x260d   :  { %1939 = vrot.lane.b32.xlu1 %v1937_v7, %s2899_s5 }
0x267f   :  { %v1940_v8 = vpop.permute.xlu1 %1939 }
0x2680   :  { %1942 = vst.msk [vmem:[#allocation3 + $0x30] sm:$0xff] %vm60_vm0, %v1940_v8  ;;  %2615 = vmatmul.mubr.msk.f32.vlgmr.msra.gmra.mrb[22].mxu1 %vm60_vm0, %v1940_v8 }
0x2687   :  { %v2060_v11 = vld [vmem:[#allocation3 + $0x30] sm:$0xff] }
0x2688   :  { %2634 = vmatprep.mubr.msk.f32.mxu0 %vm60_vm0, %v2060_v11 }
0x2753   :  { %v2012_v12 = vpop.f32.mrb[22].mxu1 }
0x2754   :  { %v2016_v14 = vadd.f32 %v2012_v12, %v1198_v9  ;;  %v2616_v18 = vpop.f32.mrb[23].mxu1 }
0x2756   :  { %2887 = vtanh.f32 %v2016_v14  ;;  %v2273_v62 = vmul.f32 -1.442695, %v2016_v14 }
0x2758   :  { %2889 = vpow2.f32 %v2273_v62 }
0x2760   :  { %v2888_v15 = vpop.eup %2887 }
0x2761   :  { %2026 = vrot.lane.b32.xlu0 %v2888_v15, %s2898_s21 }
0x2762   :  { %v2890_v16 = vpop.eup %2889 }
0x2763   :  { %v2020_v19 = vadd.f32 1.0, %v2890_v16 }
0x2765   :  { %2891 = vrcp.f32 %v2020_v19 }
0x276f   :  { %v2892_v21 = vpop.eup %2891 }
0x2770   :  { %v2024_v25 = vmul.f32 %v2892_v21, %v1931_v50 }
0x27d3   :  { %v2027_v13 = vpop.permute.xlu0 %2026 }
0x27d4   :  { %v2029_v0 = vmul.f32 %v2892_v21, %v2027_v13 }
0x27d6   :  { %2031 = vrot.lane.b32.xlu1 %v2029_v0, %s2899_s5 }
0x2848   :  { %v2032_v49 = vpop.permute.xlu1 %2031 }
0x2849   :  { %v2034_v10 = vadd.f32 %v2032_v49, %v2024_v25 }
0x284b   :  { %2893 = vtanh.f32 %v2034_v10 }
0x2855   :  { %v2894_v4 = vpop.eup %2893 }
0x2856   :  { %2037 = vrot.lane.b32.xlu0 %v2894_v4, %s2898_s21 }
0x285a   :  { %1049 = vrot.lane.b32.xlu0 %v3247_v45, %s2900_s1 }
0x28c8   :  { %v2038_v26 = vpop.permute.xlu0 %2037 }
0x28c9   :  { %v2040_v17 = vmul.f32 %v2892_v21, %v2038_v26 }
0x28cb   :  { %2042 = vrot.lane.b32.xlu1 %v2040_v17, %s2899_s5 }
0x28cc   :  { %v1050_v20 = vpop.permute.xlu0 %1049 }
0x28cd   :  { %1052 = vst.msk [vmem:[%s3430_s13] sm:$0xff] %vm60_vm0, %v1050_v20 }
0x28cf   :  { %2049 = vrot.lane.b32.xlu1 %v2034_v10, %s2900_s1 }
0x293d   :  { %v2043_v22 = vpop.permute.xlu1 %2042 }
0x293e   :  { %2045 = vst.msk [vmem:[#allocation3 + $0x38] sm:$0xff] %vm60_vm0, %v2043_v22  ;;  %2274 = vst.msk [vmem:[%s3426_s12 + $0x8] sm:$0xff] %vm60_vm0, %v2043_v22 }
0x2941   :  { %v2050_v45 = vpop.permute.xlu1 %2049 }
0x2942   :  { %2275 = vst.msk [vmem:[%s3430_s13 + $0x8] sm:$0xff] %vm60_vm0, %v2050_v45 }
0x2945   :  { %v2061_v24 = vld [vmem:[#allocation3 + $0x38] sm:$0xff] }
0x2946   :  { %2635 = vmatmul.mubr.msk.f32.gmra.mrb[30].mxu0 %vm60_vm0, %v2061_v24 }
0x2a19   :  { %v2636_v48 = vpop.f32.mrb[30].mxu0 }
0x2a1a   :  { %v2199_v28 = vadd.f32 %v2636_v48, %v3354_v42  ;;  %v2193_v29 = vpop.f32.mrb[31].mxu0 }
0x2a1b   :  { %v2194_v30 = vadd.f32 %v3354_v42, %v2193_v29 }
0x2a1c   :  { %2209 = vst [vmem:[%s3429_s11 + $0x38] sm:$0xff] %v2199_v28 }
0x2a1d   :  { %2208 = vst [vmem:[%s3429_s11 + $0x30] sm:$0xff] %v2194_v30 }

</bundles_post_ra>
